<compile_context>
chip_gen: v5e
topology: v5e:2x2
jax: 0.10.0
libtpu: 0.0.40
codegen_flags: <defaults>
</compile_context>

<pallas_src>
import functools

import jax
import jax.numpy as jnp
from jax import lax
from jax.experimental import pallas as pl
from jax.experimental.pallas import tpu as pltpu


# ----------------------------- configuration --------------------------------
INPUT_DIM = 32        # input_dim
CODEBOOK_SIZE = 64    # codebook_size
CODEBOOK_DIM = 8      # codebook_dim
N_CODEBOOKS = 4       # len(vq_strides), strides all == 1
B, T = 2, 128         # batch, time  (N = B*T = 256 tokens -> 1 full-width step)


# ------------------------------- kernel --------------------------------------
def _rvq_kernel(x_ref, wsim_ref, bsim_ref, cbo_ref, zq_ref, codes_ref,
                *, n_codebooks, codebook_size):
    """One tile of tokens (on lanes), all quantizers (residual loop unrolled).

    x_ref     : (D, tn)        tokens: channels on sublanes, tokens on lanes
    wsim_ref  : (nq, cs, D)    fused in_proj + normalized-codebook similarity W
    bsim_ref  : (nq, cs, 1)    fused similarity bias (column vectors)
    cbo_ref   : (nq, D, cs)    fused lookup table: W_out @ codebook^T + b_out
    zq_ref    : (D, tn)        quantized output tokens (accumulated in place)
    codes_ref : (nq, tn)       selected code indices per quantizer
    """
    res = x_ref[...].astype(jnp.float32)                     # (D, tn)
    tn = res.shape[1]
    # sublane iota over the codebook axis; hoisted out of the quantizer loop.
    sub_iota = lax.broadcasted_iota(jnp.int32, (codebook_size, tn), 0)

    idx_rows = []
    for q in range(n_codebooks):
        w_sim = wsim_ref[q]                                  # (cs, D)
        b_sim = bsim_ref[q]                                  # (cs, 1)
        cbo = cbo_ref[q]                                     # (D, cs)

        # Fused in_proj + nearest-code search.  With the codebook
        # pre-normalized, argmax(-dist) == argmax(z_e . c_n): |e_n|^2 is
        # constant per token, |c_n|^2 == 1, and normalizing z_e only rescales
        # each column, which cannot change the argmax.  z_e itself is never
        # needed, so (cs,cd)@(cd,tn) after (cd,D)@(D,tn) collapses into one
        # (cs,D)@(D,tn) matmul.
        sim = jnp.dot(w_sim, res, preferred_element_type=jnp.float32) + b_sim  # (cs, tn)

        # First maximal index (matches torch .max(1)[1] tie behavior).
        # NOTE: if a token column is all-NaN the onehot below is all-zero and
        # that token's contribution is silently zeroed (reference propagates
        # NaN); acceptable for finite inputs.
        # TODO(synk): if the bundle dump shows the XLU binding, pack value+idx
        #             into a single reduce instead of max + min.
        max_v = jnp.max(sim, axis=0, keepdims=True)                        # (1, tn)
        idx = jnp.min(jnp.where(sim == max_v, sub_iota, codebook_size),
                      axis=0, keepdims=True)                               # (1, tn) int32
        idx_rows.append(idx)

        # Straight-through forward value is z_q_i = out_proj(codebook[idx]);
        # lookup + out_proj (+ bias, folded into cbo) is one K=cs matmul.
        onehot = (sub_iota == idx).astype(jnp.float32)                     # (cs, tn)
        out_i = jnp.dot(cbo, onehot, preferred_element_type=jnp.float32)   # (D, tn)

        # Accumulate z_q in the output VMEM buffer (reference order
        # ((a+b)+c)+d); keeps only `res` live across quantizers at large tn.
        if q == 0:
            zq_ref[...] = out_i
        else:
            zq_ref[...] = zq_ref[...] + out_i
        if q + 1 < n_codebooks:
            res = res - out_i

    # Single lane-dense write of all code rows (instead of nq masked stores).
    codes_ref[...] = jnp.concatenate(idx_rows, axis=0)


# ------------------------------- wrapper --------------------------------------
def _pick_tile_n(n):
    """Pick a lane-dense token tile.

    The kernel is per-grid-step-overhead bound, so use the biggest tile that
    divides N.  Small N (<= 1024): one full-width step (splitting only adds
    fixed step overhead, even on 2-TC v7x).  Large N: largest multiple of 256
    up to 2048, preferring an even step count >= 2 so both v7x TensorCores
    stay balanced.
    """
    if n <= 1024:
        return n
    for want_even in (True, False):
        for cand in (2048, 1792, 1536, 1280, 1024, 768, 512, 384, 256, 128):
            if n % cand:
                continue
            steps = n // cand
            if steps < 2:
                continue
            if want_even and steps % 2:
                continue
            return cand
    return n


def residual_vector_quantize(z, params, *, tile_n=None):
    """z: (B, D, T) float32 — same convention as the PyTorch module.

    params: (w_in (nq,cd,D), b_in (nq,cd), codebook (nq,cs,cd),
             w_out (nq,D,cd), b_out (nq,D))  — raw module parameters.

    Returns (z_q (B, D, T), codes: list of (B, T) int32), matching forward().
    """
    w_in, b_in, cb, w_out, b_out = params
    nq, cd, d = w_in.shape
    cs = cb.shape[1]

    b, d_in, t = z.shape
    assert d_in == d
    n = b * t

    if tile_n is None:
        tile_n = _pick_tile_n(n)
    assert n % tile_n == 0

    # ---- one-time precompute outside the kernel (plain XLA, tiny) ----
    # tokens-on-lanes: (B, D, T) -> (D, N) with token index = b*T + t
    x = jnp.transpose(z, (1, 0, 2)).reshape(d, n).astype(jnp.float32)
    # F.normalize(codebook) (p=2, eps=1e-12), hoisted out of the kernel.
    cb = cb.astype(jnp.float32)
    cb_norm = jnp.sqrt(jnp.sum(cb * cb, axis=-1, keepdims=True))
    c_n = cb / jnp.maximum(cb_norm, 1e-12)                        # (nq, cs, cd)
    hi = lax.Precision.HIGHEST
    # fused in_proj + similarity:  sim = (c_n @ W_in) @ res + (c_n @ b_in)
    w_sim = jnp.einsum('qkc,qcd->qkd', c_n, w_in.astype(jnp.float32),
                       precision=hi)                              # (nq, cs, D)
    b_sim = jnp.einsum('qkc,qc->qk', c_n, b_in.astype(jnp.float32),
                       precision=hi)[:, :, None]                  # (nq, cs, 1)
    # fused lookup + out_proj table, output bias folded in: (nq, D, cs)
    cbo = (jnp.einsum('qdc,qkc->qdk', w_out.astype(jnp.float32), cb,
                      precision=hi)
           + b_out.astype(jnp.float32)[:, :, None])

    kernel = functools.partial(_rvq_kernel, n_codebooks=nq, codebook_size=cs)

    zq_flat, codes_flat = pl.pallas_call(
        kernel,
        out_shape=(
            jax.ShapeDtypeStruct((d, n), jnp.float32),
            jax.ShapeDtypeStruct((nq, n), jnp.int32),
        ),
        grid_spec=pltpu.PrefetchScalarGridSpec(
            num_scalar_prefetch=0,
            grid=(n // tile_n,),
            in_specs=[
                pl.BlockSpec((d, tile_n), lambda i: (0, i)),      # tokens
                pl.BlockSpec((nq, cs, d), lambda i: (0, 0, 0)),   # fused sim W
                pl.BlockSpec((nq, cs, 1), lambda i: (0, 0, 0)),   # fused sim b
                pl.BlockSpec((nq, d, cs), lambda i: (0, 0, 0)),   # fused lookup/out_proj
            ],
            out_specs=[
                pl.BlockSpec((d, tile_n), lambda i: (0, i)),      # z_q   (lane-dense)
                pl.BlockSpec((nq, tile_n), lambda i: (0, i)),     # codes (lane-dense)
            ],
        ),
        # Per-tile live set stays well under every generation's scoped VMEM
        # default (<3 MiB even at tile_n=2048 with cs=64).  Pass an explicit
        # vmem_limit_bytes only when scaling tile_n past ~2048 *and*
        # codebook_size to 1024 (v5e scoped default is 16 MiB).
        compiler_params=pltpu.CompilerParams(
            dimension_semantics=("parallel",)),
    )(x, w_sim, b_sim, cbo)

    # back to PyTorch conventions
    z_q = jnp.transpose(zq_flat.reshape(d, b, t), (1, 0, 2))      # (B, D, T)
    codes_qbt = codes_flat.reshape(nq, b, t)
    codes = [codes_qbt[q] for q in range(nq)]                     # list of (B, T)
    return z_q, codes


def make_params(key, *, input_dim=INPUT_DIM, codebook_size=CODEBOOK_SIZE,
                codebook_dim=CODEBOOK_DIM, n_codebooks=N_CODEBOOKS):
    """Deterministic synthetic module parameters (stacked over quantizers)."""
    ks = jax.random.split(key, 5)
    # in_proj: Conv1d(input_dim -> codebook_dim, k=1)  weight (cd, D), bias (cd,)
    w_in = jax.random.normal(ks[0], (n_codebooks, codebook_dim, input_dim),
                             jnp.float32) * 0.1
    b_in = jax.random.normal(ks[1], (n_codebooks, codebook_dim),
                             jnp.float32) * 0.05
    # codebook: Embedding(codebook_size, codebook_dim)
    cb = jax.random.normal(ks[2], (n_codebooks, codebook_size, codebook_dim),
                           jnp.float32)
    # out_proj: Conv1d(codebook_dim -> input_dim, k=1)  weight (D, cd), bias (D,)
    w_out = jax.random.normal(ks[3], (n_codebooks, input_dim, codebook_dim),
                              jnp.float32) * 0.1
    b_out = jax.random.normal(ks[4], (n_codebooks, input_dim),
                              jnp.float32) * 0.05
    return w_in, b_in, cb, w_out, b_out


if __name__ == "__main__":
    key = jax.random.PRNGKey(0)
    k_param, k_data = jax.random.split(key)

    params = make_params(k_param)
    z = jax.random.normal(k_data, (B, INPUT_DIM, T), jnp.float32)  # (B, C, T)

    z_q, codes = residual_vector_quantize(z, params)
    jax.block_until_ready(z_q)
    for c in codes:
        jax.block_until_ready(c)

    assert z_q.shape == (B, INPUT_DIM, T)
    assert bool(jnp.all(jnp.isfinite(z_q)))
    assert len(codes) == N_CODEBOOKS
    assert all(c.shape == (B, T) and c.dtype == jnp.int32 for c in codes)
    assert all(bool(jnp.all((c >= 0) & (c < CODEBOOK_SIZE))) for c in codes)
    print("KERNEL_OK")
</pallas_src>

<mosaic_0001>
module attributes {stable_mosaic.version = 11 : i64} {
  func.func @_rvq_kernel(%arg0: i32, %arg1: memref<32x256xf32, #tpu.memory_space<vmem>>, %arg2: memref<4x64x32xf32, #tpu.memory_space<vmem>>, %arg3: memref<4x64x1xf32, #tpu.memory_space<vmem>>, %arg4: memref<4x32x64xf32, #tpu.memory_space<vmem>>, %arg5: memref<32x256xf32, #tpu.memory_space<vmem>>, %arg6: memref<4x256xi32, #tpu.memory_space<vmem>>) attributes {dimension_semantics = [#tpu.dimension_semantics<parallel>], iteration_bounds = array<i64: 1>, scalar_prefetch = 0 : i64, scratch_operands = 0 : i64, tpu.core_type = #tpu.core_type<tc>, window_params = [{transform_indices = @transform_0, window_bounds = array<i64: 32, 256>}, {pipeline_mode = #tpu.pipeline_mode<synchronous>, transform_indices = @transform_1, window_bounds = array<i64: 4, 64, 32>}, {pipeline_mode = #tpu.pipeline_mode<synchronous>, transform_indices = @transform_2, window_bounds = array<i64: 4, 64, 1>}, {pipeline_mode = #tpu.pipeline_mode<synchronous>, transform_indices = @transform_3, window_bounds = array<i64: 4, 32, 64>}, {transform_indices = @transform_4, window_bounds = array<i64: 32, 256>}, {transform_indices = @transform_5, window_bounds = array<i64: 4, 256>}]} {
    %c0 = arith.constant 0 : index
    %c0_0 = arith.constant 0 : index
    %0 = vector.load %arg1[%c0, %c0_0] : memref<32x256xf32, #tpu.memory_space<vmem>>, vector<32x256xf32>
    %1 = tpu.iota {dimensions = array<i32: 0>} : vector<64x256xi32>
    %c0_1 = arith.constant 0 : index
    %c0_2 = arith.constant 0 : index
    %c0_3 = arith.constant 0 : index
    %2 = vector.load %arg2[%c0_1, %c0_2, %c0_3] : memref<4x64x32xf32, #tpu.memory_space<vmem>>, vector<1x64x32xf32>
    %3 = vector.shape_cast %2 : vector<1x64x32xf32> to vector<64x32xf32>
    %c0_4 = arith.constant 0 : index
    %c0_5 = arith.constant 0 : index
    %c0_6 = arith.constant 0 : index
    %4 = vector.load %arg3[%c0_4, %c0_5, %c0_6] : memref<4x64x1xf32, #tpu.memory_space<vmem>>, vector<1x64x1xf32>
    %5 = vector.shape_cast %4 : vector<1x64x1xf32> to vector<64x1xf32>
    %c0_7 = arith.constant 0 : index
    %c0_8 = arith.constant 0 : index
    %c0_9 = arith.constant 0 : index
    %6 = vector.load %arg4[%c0_7, %c0_8, %c0_9] : memref<4x32x64xf32, #tpu.memory_space<vmem>>, vector<1x32x64xf32>
    %7 = vector.shape_cast %6 : vector<1x32x64xf32> to vector<32x64xf32>
    %cst = arith.constant dense<0.000000e+00> : vector<64x256xf32>
    %8 = tpu.matmul %3, %0, %cst {dimension_numbers = #tpu.dot_dimension_numbers<[1], [0], [0], [1], [0, 0, 1, 1], [], []>} : vector<64x32xf32>, vector<32x256xf32>, vector<64x256xf32> -> vector<64x256xf32>
    %9 = vector.broadcast %5 : vector<64x1xf32> to vector<64x256xf32>
    %10 = arith.addf %8, %9 : vector<64x256xf32>
    %cst_10 = arith.constant dense<0xFF800000> : vector<256xf32>
    %11 = vector.multi_reduction <maximumf>, %10, %cst_10 [0] : vector<64x256xf32> to vector<256xf32>
    %12 = vector.shape_cast %11 : vector<256xf32> to vector<1x256xf32>
    %13 = vector.broadcast %12 : vector<1x256xf32> to vector<64x256xf32>
    %14 = arith.cmpf oeq, %10, %13 : vector<64x256xf32>
    %c64_i32 = arith.constant 64 : i32
    %15 = vector.broadcast %c64_i32 : i32 to vector<64x256xi32>
    %16 = arith.select %14, %1, %15 : vector<64x256xi1>, vector<64x256xi32>
    %cst_11 = arith.constant dense<2147483647> : vector<256xi32>
    %17 = vector.multi_reduction <minsi>, %16, %cst_11 [0] : vector<64x256xi32> to vector<256xi32>
    %18 = vector.shape_cast %17 : vector<256xi32> to vector<1x256xi32>
    %19 = vector.broadcast %18 : vector<1x256xi32> to vector<64x256xi32>
    %20 = arith.cmpi eq, %1, %19 : vector<64x256xi32>
    %21 = arith.extui %20 : vector<64x256xi1> to vector<64x256xi32>
    %22 = arith.sitofp %21 : vector<64x256xi32> to vector<64x256xf32>
    %cst_12 = arith.constant dense<0.000000e+00> : vector<32x256xf32>
    %23 = tpu.matmul %7, %22, %cst_12 {dimension_numbers = #tpu.dot_dimension_numbers<[1], [0], [0], [1], [0, 0, 1, 1], [], []>} : vector<32x64xf32>, vector<64x256xf32>, vector<32x256xf32> -> vector<32x256xf32>
    %c0_13 = arith.constant 0 : index
    %c0_14 = arith.constant 0 : index
    %24 = vector.load %arg5[%c0_13, %c0_14] : memref<32x256xf32, #tpu.memory_space<vmem>>, vector<32x256xf32>
    tpu.vector_store %arg5[%c0_13, %c0_14], %23 {strides = array<i32>} : memref<32x256xf32, #tpu.memory_space<vmem>>, vector<32x256xf32>,
    %25 = arith.subf %0, %23 : vector<32x256xf32>
    %c1 = arith.constant 1 : index
    %c0_15 = arith.constant 0 : index
    %c0_16 = arith.constant 0 : index
    %26 = vector.load %arg2[%c1, %c0_15, %c0_16] : memref<4x64x32xf32, #tpu.memory_space<vmem>>, vector<1x64x32xf32>
    %27 = vector.shape_cast %26 : vector<1x64x32xf32> to vector<64x32xf32>
    %c1_17 = arith.constant 1 : index
    %c0_18 = arith.constant 0 : index
    %c0_19 = arith.constant 0 : index
    %28 = vector.load %arg3[%c1_17, %c0_18, %c0_19] : memref<4x64x1xf32, #tpu.memory_space<vmem>>, vector<1x64x1xf32>
    %29 = vector.shape_cast %28 : vector<1x64x1xf32> to vector<64x1xf32>
    %c1_20 = arith.constant 1 : index
    %c0_21 = arith.constant 0 : index
    %c0_22 = arith.constant 0 : index
    %30 = vector.load %arg4[%c1_20, %c0_21, %c0_22] : memref<4x32x64xf32, #tpu.memory_space<vmem>>, vector<1x32x64xf32>
    %31 = vector.shape_cast %30 : vector<1x32x64xf32> to vector<32x64xf32>
    %cst_23 = arith.constant dense<0.000000e+00> : vector<64x256xf32>
    %32 = tpu.matmul %27, %25, %cst_23 {dimension_numbers = #tpu.dot_dimension_numbers<[1], [0], [0], [1], [0, 0, 1, 1], [], []>} : vector<64x32xf32>, vector<32x256xf32>, vector<64x256xf32> -> vector<64x256xf32>
    %33 = vector.broadcast %29 : vector<64x1xf32> to vector<64x256xf32>
    %34 = arith.addf %32, %33 : vector<64x256xf32>
    %cst_24 = arith.constant dense<0xFF800000> : vector<256xf32>
    %35 = vector.multi_reduction <maximumf>, %34, %cst_24 [0] : vector<64x256xf32> to vector<256xf32>
    %36 = vector.shape_cast %35 : vector<256xf32> to vector<1x256xf32>
    %37 = vector.broadcast %36 : vector<1x256xf32> to vector<64x256xf32>
    %38 = arith.cmpf oeq, %34, %37 : vector<64x256xf32>
    %c64_i32_25 = arith.constant 64 : i32
    %39 = vector.broadcast %c64_i32_25 : i32 to vector<64x256xi32>
    %40 = arith.select %38, %1, %39 : vector<64x256xi1>, vector<64x256xi32>
    %cst_26 = arith.constant dense<2147483647> : vector<256xi32>
    %41 = vector.multi_reduction <minsi>, %40, %cst_26 [0] : vector<64x256xi32> to vector<256xi32>
    %42 = vector.shape_cast %41 : vector<256xi32> to vector<1x256xi32>
    %43 = vector.broadcast %42 : vector<1x256xi32> to vector<64x256xi32>
    %44 = arith.cmpi eq, %1, %43 : vector<64x256xi32>
    %45 = arith.extui %44 : vector<64x256xi1> to vector<64x256xi32>
    %46 = arith.sitofp %45 : vector<64x256xi32> to vector<64x256xf32>
    %cst_27 = arith.constant dense<0.000000e+00> : vector<32x256xf32>
    %47 = tpu.matmul %31, %46, %cst_27 {dimension_numbers = #tpu.dot_dimension_numbers<[1], [0], [0], [1], [0, 0, 1, 1], [], []>} : vector<32x64xf32>, vector<64x256xf32>, vector<32x256xf32> -> vector<32x256xf32>
    %c0_28 = arith.constant 0 : index
    %c0_29 = arith.constant 0 : index
    %48 = vector.load %arg5[%c0_28, %c0_29] : memref<32x256xf32, #tpu.memory_space<vmem>>, vector<32x256xf32>
    %49 = arith.addf %48, %47 : vector<32x256xf32>
    %c0_30 = arith.constant 0 : index
    %c0_31 = arith.constant 0 : index
    %50 = vector.load %arg5[%c0_30, %c0_31] : memref<32x256xf32, #tpu.memory_space<vmem>>, vector<32x256xf32>
    tpu.vector_store %arg5[%c0_30, %c0_31], %49 {strides = array<i32>} : memref<32x256xf32, #tpu.memory_space<vmem>>, vector<32x256xf32>,
    %51 = arith.subf %25, %47 : vector<32x256xf32>
    %c2 = arith.constant 2 : index
    %c0_32 = arith.constant 0 : index
    %c0_33 = arith.constant 0 : index
    %52 = vector.load %arg2[%c2, %c0_32, %c0_33] : memref<4x64x32xf32, #tpu.memory_space<vmem>>, vector<1x64x32xf32>
    %53 = vector.shape_cast %52 : vector<1x64x32xf32> to vector<64x32xf32>
    %c2_34 = arith.constant 2 : index
    %c0_35 = arith.constant 0 : index
    %c0_36 = arith.constant 0 : index
    %54 = vector.load %arg3[%c2_34, %c0_35, %c0_36] : memref<4x64x1xf32, #tpu.memory_space<vmem>>, vector<1x64x1xf32>
    %55 = vector.shape_cast %54 : vector<1x64x1xf32> to vector<64x1xf32>
    %c2_37 = arith.constant 2 : index
    %c0_38 = arith.constant 0 : index
    %c0_39 = arith.constant 0 : index
    %56 = vector.load %arg4[%c2_37, %c0_38, %c0_39] : memref<4x32x64xf32, #tpu.memory_space<vmem>>, vector<1x32x64xf32>
    %57 = vector.shape_cast %56 : vector<1x32x64xf32> to vector<32x64xf32>
    %cst_40 = arith.constant dense<0.000000e+00> : vector<64x256xf32>
    %58 = tpu.matmul %53, %51, %cst_40 {dimension_numbers = #tpu.dot_dimension_numbers<[1], [0], [0], [1], [0, 0, 1, 1], [], []>} : vector<64x32xf32>, vector<32x256xf32>, vector<64x256xf32> -> vector<64x256xf32>
    %59 = vector.broadcast %55 : vector<64x1xf32> to vector<64x256xf32>
    %60 = arith.addf %58, %59 : vector<64x256xf32>
    %cst_41 = arith.constant dense<0xFF800000> : vector<256xf32>
    %61 = vector.multi_reduction <maximumf>, %60, %cst_41 [0] : vector<64x256xf32> to vector<256xf32>
    %62 = vector.shape_cast %61 : vector<256xf32> to vector<1x256xf32>
    %63 = vector.broadcast %62 : vector<1x256xf32> to vector<64x256xf32>
    %64 = arith.cmpf oeq, %60, %63 : vector<64x256xf32>
    %c64_i32_42 = arith.constant 64 : i32
    %65 = vector.broadcast %c64_i32_42 : i32 to vector<64x256xi32>
    %66 = arith.select %64, %1, %65 : vector<64x256xi1>, vector<64x256xi32>
    %cst_43 = arith.constant dense<2147483647> : vector<256xi32>
    %67 = vector.multi_reduction <minsi>, %66, %cst_43 [0] : vector<64x256xi32> to vector<256xi32>
    %68 = vector.shape_cast %67 : vector<256xi32> to vector<1x256xi32>
    %69 = vector.broadcast %68 : vector<1x256xi32> to vector<64x256xi32>
    %70 = arith.cmpi eq, %1, %69 : vector<64x256xi32>
    %71 = arith.extui %70 : vector<64x256xi1> to vector<64x256xi32>
    %72 = arith.sitofp %71 : vector<64x256xi32> to vector<64x256xf32>
    %cst_44 = arith.constant dense<0.000000e+00> : vector<32x256xf32>
    %73 = tpu.matmul %57, %72, %cst_44 {dimension_numbers = #tpu.dot_dimension_numbers<[1], [0], [0], [1], [0, 0, 1, 1], [], []>} : vector<32x64xf32>, vector<64x256xf32>, vector<32x256xf32> -> vector<32x256xf32>
    %c0_45 = arith.constant 0 : index
    %c0_46 = arith.constant 0 : index
    %74 = vector.load %arg5[%c0_45, %c0_46] : memref<32x256xf32, #tpu.memory_space<vmem>>, vector<32x256xf32>
    %75 = arith.addf %74, %73 : vector<32x256xf32>
    %c0_47 = arith.constant 0 : index
    %c0_48 = arith.constant 0 : index
    %76 = vector.load %arg5[%c0_47, %c0_48] : memref<32x256xf32, #tpu.memory_space<vmem>>, vector<32x256xf32>
    tpu.vector_store %arg5[%c0_47, %c0_48], %75 {strides = array<i32>} : memref<32x256xf32, #tpu.memory_space<vmem>>, vector<32x256xf32>,
    %77 = arith.subf %51, %73 : vector<32x256xf32>
    %c3 = arith.constant 3 : index
    %c0_49 = arith.constant 0 : index
    %c0_50 = arith.constant 0 : index
    %78 = vector.load %arg2[%c3, %c0_49, %c0_50] : memref<4x64x32xf32, #tpu.memory_space<vmem>>, vector<1x64x32xf32>
    %79 = vector.shape_cast %78 : vector<1x64x32xf32> to vector<64x32xf32>
    %c3_51 = arith.constant 3 : index
    %c0_52 = arith.constant 0 : index
    %c0_53 = arith.constant 0 : index
    %80 = vector.load %arg3[%c3_51, %c0_52, %c0_53] : memref<4x64x1xf32, #tpu.memory_space<vmem>>, vector<1x64x1xf32>
    %81 = vector.shape_cast %80 : vector<1x64x1xf32> to vector<64x1xf32>
    %c3_54 = arith.constant 3 : index
    %c0_55 = arith.constant 0 : index
    %c0_56 = arith.constant 0 : index
    %82 = vector.load %arg4[%c3_54, %c0_55, %c0_56] : memref<4x32x64xf32, #tpu.memory_space<vmem>>, vector<1x32x64xf32>
    %83 = vector.shape_cast %82 : vector<1x32x64xf32> to vector<32x64xf32>
    %cst_57 = arith.constant dense<0.000000e+00> : vector<64x256xf32>
    %84 = tpu.matmul %79, %77, %cst_57 {dimension_numbers = #tpu.dot_dimension_numbers<[1], [0], [0], [1], [0, 0, 1, 1], [], []>} : vector<64x32xf32>, vector<32x256xf32>, vector<64x256xf32> -> vector<64x256xf32>
    %85 = vector.broadcast %81 : vector<64x1xf32> to vector<64x256xf32>
    %86 = arith.addf %84, %85 : vector<64x256xf32>
    %cst_58 = arith.constant dense<0xFF800000> : vector<256xf32>
    %87 = vector.multi_reduction <maximumf>, %86, %cst_58 [0] : vector<64x256xf32> to vector<256xf32>
    %88 = vector.shape_cast %87 : vector<256xf32> to vector<1x256xf32>
    %89 = vector.broadcast %88 : vector<1x256xf32> to vector<64x256xf32>
    %90 = arith.cmpf oeq, %86, %89 : vector<64x256xf32>
    %c64_i32_59 = arith.constant 64 : i32
    %91 = vector.broadcast %c64_i32_59 : i32 to vector<64x256xi32>
    %92 = arith.select %90, %1, %91 : vector<64x256xi1>, vector<64x256xi32>
    %cst_60 = arith.constant dense<2147483647> : vector<256xi32>
    %93 = vector.multi_reduction <minsi>, %92, %cst_60 [0] : vector<64x256xi32> to vector<256xi32>
    %94 = vector.shape_cast %93 : vector<256xi32> to vector<1x256xi32>
    %95 = vector.broadcast %94 : vector<1x256xi32> to vector<64x256xi32>
    %96 = arith.cmpi eq, %1, %95 : vector<64x256xi32>
    %97 = arith.extui %96 : vector<64x256xi1> to vector<64x256xi32>
    %98 = arith.sitofp %97 : vector<64x256xi32> to vector<64x256xf32>
    %cst_61 = arith.constant dense<0.000000e+00> : vector<32x256xf32>
    %99 = tpu.matmul %83, %98, %cst_61 {dimension_numbers = #tpu.dot_dimension_numbers<[1], [0], [0], [1], [0, 0, 1, 1], [], []>} : vector<32x64xf32>, vector<64x256xf32>, vector<32x256xf32> -> vector<32x256xf32>
    %c0_62 = arith.constant 0 : index
    %c0_63 = arith.constant 0 : index
    %100 = vector.load %arg5[%c0_62, %c0_63] : memref<32x256xf32, #tpu.memory_space<vmem>>, vector<32x256xf32>
    %101 = arith.addf %100, %99 : vector<32x256xf32>
    %c0_64 = arith.constant 0 : index
    %c0_65 = arith.constant 0 : index
    %102 = vector.load %arg5[%c0_64, %c0_65] : memref<32x256xf32, #tpu.memory_space<vmem>>, vector<32x256xf32>
    tpu.vector_store %arg5[%c0_64, %c0_65], %101 {strides = array<i32>} : memref<32x256xf32, #tpu.memory_space<vmem>>, vector<32x256xf32>,
    %103 = tpu.concatenate %18, %42, %68, %94 in 0 : vector<1x256xi32>, vector<1x256xi32>, vector<1x256xi32>, vector<1x256xi32> -> vector<4x256xi32>
    %c0_66 = arith.constant 0 : index
    %c0_67 = arith.constant 0 : index
    %104 = vector.load %arg6[%c0_66, %c0_67] : memref<4x256xi32, #tpu.memory_space<vmem>>, vector<4x256xi32>
    tpu.vector_store %arg6[%c0_66, %c0_67], %103 {strides = array<i32>} : memref<4x256xi32, #tpu.memory_space<vmem>>, vector<4x256xi32>,
    return
  }
  func.func @transform_0(%arg0: i32) -> (i32, i32) {
    %c0_i32 = arith.constant 0 : i32
    %c0_i32_0 = arith.constant 0 : i32
    return %c0_i32, %arg0 : i32, i32
  }
  func.func @transform_1(%arg0: i32) -> (i32, i32, i32) {
    %c0_i32 = arith.constant 0 : i32
    %c0_i32_0 = arith.constant 0 : i32
    %c0_i32_1 = arith.constant 0 : i32
    %c0_i32_2 = arith.constant 0 : i32
    return %c0_i32, %c0_i32_0, %c0_i32_1 : i32, i32, i32
  }
  func.func @transform_2(%arg0: i32) -> (i32, i32, i32) {
    %c0_i32 = arith.constant 0 : i32
    %c0_i32_0 = arith.constant 0 : i32
    %c0_i32_1 = arith.constant 0 : i32
    %c0_i32_2 = arith.constant 0 : i32
    return %c0_i32, %c0_i32_0, %c0_i32_1 : i32, i32, i32
  }
  func.func @transform_3(%arg0: i32) -> (i32, i32, i32) {
    %c0_i32 = arith.constant 0 : i32
    %c0_i32_0 = arith.constant 0 : i32
    %c0_i32_1 = arith.constant 0 : i32
    %c0_i32_2 = arith.constant 0 : i32
    return %c0_i32, %c0_i32_0, %c0_i32_1 : i32, i32, i32
  }
  func.func @transform_4(%arg0: i32) -> (i32, i32) {
    %c0_i32 = arith.constant 0 : i32
    %c0_i32_0 = arith.constant 0 : i32
    return %c0_i32, %arg0 : i32, i32
  }
  func.func @transform_5(%arg0: i32) -> (i32, i32) {
    %c0_i32 = arith.constant 0 : i32
    %c0_i32_0 = arith.constant 0 : i32
    return %c0_i32, %arg0 : i32, i32
  }
}

</mosaic_0001>

<bundles_post_ra>
// kernel: tpu_custom_call.1
= control target key start
LH: loop header
LB: loop body
LE: loop exit
PB: predicated region body
PF: predicated region fallthrough
CT: control target
= control target key end

     0   :  { %11 = vsyncpa [#allocation3], 0  ;;  %v2097_v3 = vmov 0   ;;  %vm98_vm0 = vcmask 261120   ;;  %s3092_s0 = inlined_call_operand.vmem [shape: f32[32,256], index: 0, kind: input, shape index: {}]   ;;  %s3093_s1 = inlined_call_operand.vmem [shape: f32[4,64,32], index: 1, kind: input, shape index: {}]   ;;  %s3094_s2 = inlined_call_operand.vmem [shape: f32[4,64,1], index: 2, kind: input, shape index: {}]   ;;  %s3095_s3 = inlined_call_operand.vmem [shape: f32[4,32,64], index: 3, kind: input, shape index: {}]   ;;  %s3096_s4 = inlined_call_operand.hbm [shape: f32[32,256], index: 4, kind: output, shape index: {0}]   ;;  %s3097_s5 = inlined_call_operand.hbm [shape: s32[4,256], index: 5, kind: output, shape index: {1}]  }
   0x1   :  { %v2136_v0 = vld [vmem:[%s3092_s0 + $0x30] sm:$0xff]  ;;  %v2141_v1 = vld [vmem:[%s3092_s0 + $0x38] sm:$0xff]  ;;  %2043 = vset.pattern.permute.xlu1 %v2097_v3  ;;  %2042 = vset.pattern.permute.xlu0 %v2097_v3  ;;  %v46_v4 = vld [vmem:[%s3094_s2] sm:$0xff] }
   0x2   :  { %v48_v2 = vld [vmem:[%s3094_s2 + $0x10] sm:$0xff]  ;;  %v2152_v5 = vld [vmem:[%s3092_s0 + $0x20] sm:$0xff]  ;;  %v2157_v6 = vld [vmem:[%s3092_s0 + $0x28] sm:$0xff]  ;;  %135 = vmatpush.msra.mxu0 %v2136_v0  ;;  %176 = vmatpush.msra.mxu1 %v2141_v1 }
   0x3   :  { %70 = vperm.xlu1 %2043, %v48_v2   ;;  %60 = vperm.xlu0 %2042, %v46_v4   ;;  %v2164_v7 = vld [vmem:[%s3092_s0 + $0x10] sm:$0xff]  ;;  %v2169_v8 = vld [vmem:[%s3092_s0 + $0x18] sm:$0xff]  ;;  %v50_v9 = vld [vmem:[%s3094_s2 + $0x20] sm:$0xff] }
   0x4   :  { %136 = vmatpush.msra.mxu0 %v2152_v5  ;;  %177 = vmatpush.msra.mxu1 %v2157_v6  ;;  %v2179_v10 = vld [vmem:[%s3092_s0] sm:$0xff]  ;;  %v2184_v11 = vld [vmem:[%s3092_s0 + $0x8] sm:$0xff]  ;;  %v49_v13 = vld [vmem:[%s3094_s2 + $0x18] sm:$0xff] }
   0x5   :  { %2044 = vset.pattern.permute.xlu2 %v2097_v3  ;;  %v38_v12 = vld [vmem:[%s3093_s1] sm:$0xff]  ;;  %v47_v14 = vld [vmem:[%s3094_s2 + $0x8] sm:$0xff] }
   0x6   :  { %137 = vmatpush.msra.mxu0 %v2164_v7  ;;  %178 = vmatpush.msra.mxu1 %v2169_v8 }
   0x7   :  { %80 = vperm.xlu2 %2044, %v50_v9  }
   0x8   :  { %138 = vmatpush.msra.mxu0 %v2179_v10  ;;  %179 = vmatpush.msra.mxu1 %v2184_v11 }
   0x9   :  { %12 = vsyncpa [#allocation5], 0  ;;  %1752 = vmatmul.msk.f32.vlgmr.msra.gmra.mxu0 %vm98_vm0, %v38_v12  ;;  %1760 = vmatmul.msk.f32.vlgmr.msra.gmra.mxu1 %vm98_vm0, %v38_v12  ;;  %v51_v15 = vld [vmem:[%s3094_s2 + $0x28] sm:$0xff]  ;;  %v53_v17 = vld [vmem:[%s3094_s2 + $0x38] sm:$0xff]  ;;  %s2099_s11 = smov [#allocation4]   ;;  %s1724_s15 = sshll.u32 %s3096_s4, 4  ;;  %s1725_s15 = int_to_ptr.hbm [resolvable:$true] %s1724_s15 }
   0xa   :  { %v39_v16 = vld [vmem:[%s3093_s1 + $0x8] sm:$0xff]  ;;  %v52_v18 = vld [vmem:[%s3094_s2 + $0x30] sm:$0xff]  ;;  %v1816_v19 = vld [vmem:[%s3094_s2 + $0x40] sm:$0xff]  ;;  %s1736_s12 = sshll.u32 %s2099_s11, 4  ;;  %s2101_s16 = smov 256   ;;  %s1737_s12 = int_to_ptr.vmem [resolvable:$true] %s1736_s12 }
   0xb   :  { %75 = vperm.xlu1 %2043, %v49_v13   ;;  %65 = vperm.xlu0 %2042, %v47_v14   ;;  %v40_v20 = vld [vmem:[%s3093_s1 + $0x10] sm:$0xff]  ;;  %v1817_v22 = vld [vmem:[%s3094_s2 + $0x48] sm:$0xff]  ;;  %v1819_v23 = vld [vmem:[%s3094_s2 + $0x58] sm:$0xff]  ;;  %s2102_s17 = smov 16  }
   0xc   :  { %v1818_v21 = vld [vmem:[%s3094_s2 + $0x50] sm:$0xff]  ;;  %v41_v24 = vld [vmem:[%s3093_s1 + $0x18] sm:$0xff]  ;;  %v1821_v25 = vld [vmem:[%s3094_s2 + $0x68] sm:$0xff] }
   0xd   :  { %v1820_v26 = vld [vmem:[%s3094_s2 + $0x60] sm:$0xff]  ;;  %v1822_v27 = vld [vmem:[%s3094_s2 + $0x70] sm:$0xff]  ;;  %v1823_v30 = vld [vmem:[%s3094_s2 + $0x78] sm:$0xff] }
   0xe   :  { %v42_v28 = vld [vmem:[%s3093_s1 + $0x20] sm:$0xff]  ;;  %v1893_v31 = vld [vmem:[%s3094_s2 + $0x88] sm:$0xff]  ;;  %v1895_v33 = vld [vmem:[%s3094_s2 + $0x98] sm:$0xff] }
   0xf   :  { %85 = vperm.xlu2 %2044, %v51_v15   ;;  %v1892_v29 = vld [vmem:[%s3094_s2 + $0x80] sm:$0xff]  ;;  %v43_v32 = vld [vmem:[%s3093_s1 + $0x28] sm:$0xff]  ;;  %v1894_v34 = vld [vmem:[%s3094_s2 + $0x90] sm:$0xff] }
  0x10   :  { %v1896_v35 = vld [vmem:[%s3094_s2 + $0xa0] sm:$0xff]  ;;  %v44_v36 = vld [vmem:[%s3093_s1 + $0x30] sm:$0xff]  ;;  %v1897_v38 = vld [vmem:[%s3094_s2 + $0xa8] sm:$0xff] }
  0x11   :  { %1753 = vmatmul.msk.f32.gmra.mxu0 %vm98_vm0, %v39_v16  ;;  %1761 = vmatmul.msk.f32.gmra.mxu1 %vm98_vm0, %v39_v16  ;;  %v1898_v37 = vld [vmem:[%s3094_s2 + $0xb0] sm:$0xff]  ;;  %v1899_v39 = vld [vmem:[%s3094_s2 + $0xb8] sm:$0xff]  ;;  %v1969_v41 = vld [vmem:[%s3094_s2 + $0xc8] sm:$0xff] }
  0x12   :  { %v45_v40 = vld [vmem:[%s3093_s1 + $0x38] sm:$0xff]  ;;  %v1968_v42 = vld [vmem:[%s3094_s2 + $0xc0] sm:$0xff]  ;;  %v1970_v43 = vld [vmem:[%s3094_s2 + $0xd0] sm:$0xff] }
  0x13   :  { %95 = vperm.xlu1 %2043, %v53_v17   ;;  %90 = vperm.xlu0 %2042, %v52_v18   ;;  %v1972_v44 = vld [vmem:[%s3094_s2 + $0xe0] sm:$0xff]  ;;  %v1971_v45 = vld [vmem:[%s3094_s2 + $0xd8] sm:$0xff]  ;;  %v1973_v46 = vld [vmem:[%s3094_s2 + $0xe8] sm:$0xff] }
  0x14   :  { %v1975_v47 = vld [vmem:[%s3094_s2 + $0xf8] sm:$0xff]  ;;  %v1974_v48 = vld [vmem:[%s3094_s2 + $0xf0] sm:$0xff]  ;;  %s1738_s2 = sshll.u32 %s3097_s5, 4  ;;  %s1739_s2 = int_to_ptr.hbm [resolvable:$true] %s1738_s2 }
  0x17   :  { %469 = vperm.xlu2 %2044, %v1816_v19  }
  0x19   :  { %1754 = vmatmul.msk.f32.gmra.mxu0 %vm98_vm0, %v40_v20  ;;  %1762 = vmatmul.msk.f32.gmra.mxu1 %vm98_vm0, %v40_v20 }
  0x1b   :  { %479 = vperm.xlu1 %2043, %v1818_v21   ;;  %474 = vperm.xlu0 %2042, %v1817_v22  }
  0x1f   :  { %484 = vperm.xlu2 %2044, %v1819_v23  }
  0x21   :  { %1755 = vmatmul.msk.f32.gmra.mxu0 %vm98_vm0, %v41_v24  ;;  %1763 = vmatmul.msk.f32.gmra.mxu1 %vm98_vm0, %v41_v24 }
  0x23   :  { %494 = vperm.xlu1 %2043, %v1821_v25   ;;  %489 = vperm.xlu0 %2042, %v1820_v26  }
  0x27   :  { %499 = vperm.xlu2 %2044, %v1822_v27  }
  0x29   :  { %1756 = vmatmul.msk.f32.gmra.mxu0 %vm98_vm0, %v42_v28  ;;  %1764 = vmatmul.msk.f32.gmra.mxu1 %vm98_vm0, %v42_v28 }
  0x2b   :  { %892 = vperm.xlu1 %2043, %v1892_v29   ;;  %504 = vperm.xlu0 %2042, %v1823_v30  }
  0x2f   :  { %897 = vperm.xlu2 %2044, %v1893_v31  }
  0x31   :  { %1757 = vmatmul.msk.f32.gmra.mxu0 %vm98_vm0, %v43_v32  ;;  %1765 = vmatmul.msk.f32.gmra.mxu1 %vm98_vm0, %v43_v32 }
  0x33   :  { %907 = vperm.xlu1 %2043, %v1895_v33   ;;  %902 = vperm.xlu0 %2042, %v1894_v34  }
  0x37   :  { %912 = vperm.xlu2 %2044, %v1896_v35  }
  0x39   :  { %1758 = vmatmul.msk.f32.gmra.mxu0 %vm98_vm0, %v44_v36  ;;  %1766 = vmatmul.msk.f32.gmra.mxu1 %vm98_vm0, %v44_v36 }
  0x3b   :  { %922 = vperm.xlu1 %2043, %v1898_v37   ;;  %917 = vperm.xlu0 %2042, %v1897_v38  }
  0x3f   :  { %927 = vperm.xlu2 %2044, %v1899_v39  }
  0x41   :  { %1759 = vmatmul.msk.f32.gmra.mxu0 %vm98_vm0, %v45_v40  ;;  %1767 = vmatmul.msk.f32.gmra.mxu1 %vm98_vm0, %v45_v40 }
  0x43   :  { %1320 = vperm.xlu1 %2043, %v1969_v41   ;;  %1315 = vperm.xlu0 %2042, %v1968_v42  }
  0x47   :  { %1325 = vperm.xlu2 %2044, %v1970_v43  }
  0x4b   :  { %1335 = vperm.xlu1 %2043, %v1972_v44   ;;  %1330 = vperm.xlu0 %2042, %v1971_v45  }
  0x4f   :  { %1340 = vperm.xlu2 %2044, %v1973_v46  }
  0x53   :  { %1350 = vperm.xlu1 %2043, %v1975_v47   ;;  %1345 = vperm.xlu0 %2042, %v1974_v48  }
  0x61   :  { %v81_v63 = vpop.permute.xlu2 %80 }
  0x69   :  { %v86_v16 = vpop.permute.xlu2 %85 }
  0x75   :  { %v61_v59 = vpop.permute.xlu0 %60  ;;  %v71_v60 = vpop.permute.xlu1 %70 }
  0x7d   :  { %v66_v2 = vpop.permute.xlu0 %65  ;;  %v76_v3 = vpop.permute.xlu1 %75 }
  0x85   :  { %v91_v25 = vpop.permute.xlu0 %90  ;;  %v96_v28 = vpop.permute.xlu1 %95 }
  0x86   :  { %v140_v49 = vpop.f32.mrf.mxu0  ;;  %v181_v50 = vpop.f32.mrf.mxu1 }
  0x87   :  { %v141_v17 = vadd.f32 %v140_v49, %v61_v59  ;;  %v2325_v18 = vadd.f32 %v181_v50, %v61_v59  ;;  %v29_v49 = vlaneseq }
  0x8e   :  { %v143_v51 = vpop.f32.mrf.mxu0  ;;  %v184_v52 = vpop.f32.mrf.mxu1 }
  0x8f   :  { %v144_v21 = vadd.f32 %v143_v51, %v66_v2  ;;  %v2329_v22 = vadd.f32 %v184_v52, %v66_v2 }
  0x96   :  { %v146_v53 = vpop.f32.mrf.mxu0  ;;  %v187_v54 = vpop.f32.mrf.mxu1 }
  0x97   :  { %v2317_v12 = vadd.f32 %v146_v53, %v71_v60  ;;  %v2319_v13 = vadd.f32 %v187_v54, %v71_v60  ;;  %v2347_v54 = vshrl.u32 %v29_v49, 7 }
  0x99   :  { %v205_v26 = vmax.f32 %v141_v17, %v2317_v12  ;;  %v218_v27 = vmax.f32 %v2325_v18, %v2319_v13  ;;  %v2350_v59 = vadd.s32 8, %v2347_v54  ;;  %v2353_v60 = vadd.s32 16, %v2347_v54 }
  0x9a   :  { %v2362_v2 = vadd.s32 40, %v2347_v54 }
  0x9e   :  { %v149_v55 = vpop.f32.mrf.mxu0  ;;  %v190_v56 = vpop.f32.mrf.mxu1 }
  0x9f   :  { %v2321_v14 = vadd.f32 %v149_v55, %v76_v3  ;;  %v2323_v15 = vadd.f32 %v190_v56, %v76_v3  ;;  %v2365_v3 = vadd.s32 48, %v2347_v54 }
  0xa1   :  { %v206_v29 = vmax.f32 %v144_v21, %v2321_v14  ;;  %v219_v30 = vmax.f32 %v2329_v22, %v2323_v15 }
  0xa6   :  { %v152_v57 = vpop.f32.mrf.mxu0  ;;  %v193_v58 = vpop.f32.mrf.mxu1 }
  0xa7   :  { %v153_v19 = vadd.f32 %v152_v57, %v81_v63  ;;  %v2327_v20 = vadd.f32 %v193_v58, %v81_v63 }
  0xa9   :  { %v207_v33 = vmax.f32 %v205_v26, %v153_v19  ;;  %v220_v34 = vmax.f32 %v218_v27, %v2327_v20 }
  0xae   :  { %v155_v61 = vpop.f32.mrf.mxu0  ;;  %v196_v62 = vpop.f32.mrf.mxu1 }
  0xaf   :  { %v156_v23 = vadd.f32 %v155_v61, %v86_v16  ;;  %v2331_v24 = vadd.f32 %v196_v62, %v86_v16  ;;  %v2356_v61 = vadd.s32 24, %v2347_v54  ;;  %v2359_v62 = vadd.s32 32, %v2347_v54 }
  0xb1   :  { %v208_v37 = vmax.f32 %v206_v29, %v156_v23  ;;  %v221_v38 = vmax.f32 %v219_v30, %v2331_v24 }
  0xb6   :  { %v158_v4 = vpop.f32.mrf.mxu0  ;;  %v199_v9 = vpop.f32.mrf.mxu1 }
  0xb7   :  { %v159_v31 = vadd.f32 %v158_v4, %v91_v25  ;;  %v2339_v32 = vadd.f32 %v199_v9, %v91_v25  ;;  %v2368_v4 = vadd.s32 56, %v2347_v54 }
  0xb9   :  { %v209_v41 = vmax.f32 %v207_v33, %v159_v31  ;;  %v222_v42 = vmax.f32 %v220_v34, %v2339_v32 }
  0xbe   :  { %v161_v35 = vpop.f32.mrf.mxu0  ;;  %v202_v36 = vpop.f32.mrf.mxu1 }
  0xbf   :  { %v162_v39 = vadd.f32 %v161_v35, %v96_v28  ;;  %v2343_v40 = vadd.f32 %v202_v36, %v96_v28 }
  0xc1   :  { %v210_v43 = vmax.f32 %v208_v37, %v162_v39  ;;  %v223_v44 = vmax.f32 %v221_v38, %v2343_v40 }
  0xc3   :  { %v211_v45 = vmax.f32 %v209_v41, %v210_v43  ;;  %v224_v46 = vmax.f32 %v222_v42, %v223_v44 }
  0xc5   :  { %v212_v47 = vrot.slane %v211_v45, 4  ;;  %v225_v48 = vrot.slane %v224_v46, 4 }
  0xc7   :  { %v213_v50 = vmax.f32 %v211_v45, %v212_v47  ;;  %v226_v51 = vmax.f32 %v224_v46, %v225_v48 }
  0xc9   :  { %v214_v52 = vrot.slane %v213_v50, 2  ;;  %v227_v53 = vrot.slane %v226_v51, 2 }
  0xcb   :  { %v215_v55 = vmax.f32 %v213_v50, %v214_v52  ;;  %v228_v56 = vmax.f32 %v226_v51, %v227_v53  ;;  %v3098_v51 = vmov 1.0  }
  0xcd   :  { %v216_v57 = vrot.slane %v215_v55, 1  ;;  %v229_v58 = vrot.slane %v228_v56, 1 }
  0xcf   :  { %v217_v63 = vmax.f32 %v215_v55, %v216_v57  ;;  %v230_v9 = vmax.f32 %v228_v56, %v229_v58  ;;  %v54_v56 = vld [vmem:[%s3095_s3] sm:$0xff]  ;;  %v55_v57 = vld [vmem:[%s3095_s3 + $0x8] sm:$0xff]  ;;  %v56_v58 = vld [vmem:[%s3095_s3 + $0x10] sm:$0xff] }
  0xd1   :  { %vm231_vm1 = vcmp.eq.f32.partialorder %v141_v17, %v217_v63  ;;  %vm233_vm2 = vcmp.eq.f32.partialorder %v144_v21, %v217_v63  ;;  %vm235_vm3 = vcmp.eq.f32.partialorder %v2317_v12, %v217_v63  ;;  %vm237_vm4 = vcmp.eq.f32.partialorder %v2321_v14, %v217_v63 }
  0xd2   :  { %vm239_vm5 = vcmp.eq.f32.partialorder %v153_v19, %v217_v63  ;;  %vm241_vm6 = vcmp.eq.f32.partialorder %v156_v23, %v217_v63  ;;  %vm243_vm7 = vcmp.eq.f32.partialorder %v159_v31, %v217_v63  ;;  %vm245_vm8 = vcmp.eq.f32.partialorder %v162_v39, %v217_v63  ;;  %v57_v63 = vld [vmem:[%s3095_s3 + $0x18] sm:$0xff] }
  0xd3   :  { %v247_v16 = vsel %vm231_vm1, %v2347_v54, 64  ;;  %v249_v25 = vsel %vm233_vm2, %v2350_v59, 64  ;;  %v251_v26 = vsel %vm235_vm3, %v2353_v60, 64  ;;  %v253_v27 = vsel %vm237_vm4, %v2356_v61, 64 }
  0xd4   :  { %v255_v28 = vsel %vm239_vm5, %v2359_v62, 64  ;;  %v257_v17 = vsel %vm241_vm6, %v2362_v2, 64  ;;  %v259_v12 = vsel %vm243_vm7, %v2365_v3, 64  ;;  %v261_v14 = vsel %vm245_vm8, %v2368_v4, 64 }
  0xd5   :  { %vm263_vm9 = vcmp.lt.s32.totalorder %v247_v16, %v251_v26  ;;  %vm265_vm10 = vcmp.lt.s32.totalorder %v249_v25, %v253_v27  ;;  %vm232_vm11 = vcmp.eq.f32.partialorder %v2325_v18, %v230_v9  ;;  %vm234_vm12 = vcmp.eq.f32.partialorder %v2329_v22, %v230_v9 }
  0xd6   :  { %v264_v19 = vsel %vm263_vm9, %v247_v16, %v251_v26  ;;  %v266_v21 = vsel %vm265_vm10, %v249_v25, %v253_v27  ;;  %vm236_vm15 = vcmp.eq.f32.partialorder %v2319_v13, %v230_v9  ;;  %vm238_vm1 = vcmp.eq.f32.partialorder %v2323_v15, %v230_v9 }
  0xd7   :  { %vm267_vm13 = vcmp.lt.s32.totalorder %v264_v19, %v255_v28  ;;  %vm269_vm14 = vcmp.lt.s32.totalorder %v266_v21, %v257_v17  ;;  %vm240_vm2 = vcmp.eq.f32.partialorder %v2327_v20, %v230_v9  ;;  %vm242_vm3 = vcmp.eq.f32.partialorder %v2331_v24, %v230_v9 }
  0xd8   :  { %v268_v23 = vsel %vm267_vm13, %v264_v19, %v255_v28  ;;  %v270_v29 = vsel %vm269_vm14, %v266_v21, %v257_v17  ;;  %v248_v30 = vsel %vm232_vm11, %v2347_v54, 64  ;;  %v250_v18 = vsel %vm234_vm12, %v2350_v59, 64 }
  0xd9   :  { %vm271_vm4 = vcmp.lt.s32.totalorder %v268_v23, %v259_v12  ;;  %vm273_vm5 = vcmp.lt.s32.totalorder %v270_v29, %v261_v14  ;;  %v252_v33 = vsel %vm236_vm15, %v2353_v60, 64  ;;  %v254_v13 = vsel %vm238_vm1, %v2356_v61, 64 }
  0xda   :  { %v272_v31 = vsel %vm271_vm4, %v268_v23, %v259_v12  ;;  %v274_v22 = vsel %vm273_vm5, %v270_v29, %v261_v14  ;;  %vm244_vm7 = vcmp.eq.f32.partialorder %v2339_v32, %v230_v9  ;;  %vm246_vm8 = vcmp.eq.f32.partialorder %v2343_v40, %v230_v9  ;;  %v1808_v23 = vld [vmem:[%s3093_s1 + $0x40] sm:$0xff]  ;;  %v1809_v29 = vld [vmem:[%s3093_s1 + $0x48] sm:$0xff] }
  0xdb   :  { %vm275_vm6 = vcmp.lt.s32.totalorder %v272_v31, %v274_v22  ;;  %v256_v20 = vsel %vm240_vm2, %v2359_v62, 64  ;;  %vm286_vm9 = vcmp.lt.s32.totalorder %v248_v30, %v252_v33  ;;  %vm288_vm10 = vcmp.lt.s32.totalorder %v250_v18, %v254_v13 }
  0xdc   :  { %v276_v15 = vsel %vm275_vm6, %v272_v31, %v274_v22  ;;  %v258_v35 = vsel %vm242_vm3, %v2362_v2, 64  ;;  %v287_v36 = vsel %vm286_vm9, %v248_v30, %v252_v33  ;;  %v289_v37 = vsel %vm288_vm10, %v250_v18, %v254_v13  ;;  %v1813_v30 = vld [vmem:[%s3093_s1 + $0x68] sm:$0xff]  ;;  %v1814_v18 = vld [vmem:[%s3093_s1 + $0x70] sm:$0xff]  ;;  %v1815_v31 = vld [vmem:[%s3093_s1 + $0x78] sm:$0xff] }
  0xdd   :  { %v277_v34 = vrot.slane %v276_v15, 4  ;;  %v260_v38 = vsel %vm244_vm7, %v2365_v3, 64  ;;  %vm290_vm11 = vcmp.lt.s32.totalorder %v287_v36, %v256_v20  ;;  %vm292_vm12 = vcmp.lt.s32.totalorder %v289_v37, %v258_v35 }
  0xde   :  { %v262_v32 = vsel %vm246_vm8, %v2368_v4, 64  ;;  %v291_v39 = vsel %vm290_vm11, %v287_v36, %v256_v20  ;;  %v293_v40 = vsel %vm292_vm12, %v289_v37, %v258_v35 }
  0xdf   :  { %vm278_vm13 = vcmp.lt.s32.totalorder %v276_v15, %v277_v34  ;;  %vm294_vm14 = vcmp.lt.s32.totalorder %v291_v39, %v260_v38  ;;  %vm296_vm15 = vcmp.lt.s32.totalorder %v293_v40, %v262_v32 }
  0xe0   :  { %v279_v41 = vsel %vm278_vm13, %v276_v15, %v277_v34  ;;  %v295_v43 = vsel %vm294_vm14, %v291_v39, %v260_v38  ;;  %v297_v44 = vsel %vm296_vm15, %v293_v40, %v262_v32  ;;  %v470_v38 = vpop.permute.xlu2 %469  ;;  %v475_v32 = vpop.permute.xlu0 %474 }
  0xe1   :  { %v280_v42 = vrot.slane %v279_v41, 2  ;;  %vm298_vm1 = vcmp.lt.s32.totalorder %v295_v43, %v297_v44 }
  0xe2   :  { %v299_v24 = vsel %vm298_vm1, %v295_v43, %v297_v44 }
  0xe3   :  { %vm281_vm2 = vcmp.lt.s32.totalorder %v279_v41, %v280_v42  ;;  %v300_v46 = vrot.slane %v299_v24, 4 }
  0xe4   :  { %v282_v45 = vsel %vm281_vm2, %v279_v41, %v280_v42  ;;  %v480_v41 = vpop.permute.xlu1 %479 }
  0xe5   :  { %v283_v47 = vrot.slane %v282_v45, 1  ;;  %vm301_vm3 = vcmp.lt.s32.totalorder %v299_v24, %v300_v46 }
  0xe6   :  { %v302_v48 = vsel %vm301_vm3, %v299_v24, %v300_v46  ;;  %vm357_vm3 = vcmask 523264  }
  0xe7   :  { %vm284_vm4 = vcmp.lt.s32.totalorder %v282_v45, %v283_v47  ;;  %v303_v50 = vrot.slane %v302_v48, 2 }
  0xe8   :  { %v2398_v49 = vsel %vm284_vm4, %v282_v45, %v283_v47  ;;  %v485_v42 = vpop.permute.xlu2 %484  ;;  %v490_v43 = vpop.permute.xlu0 %489 }
  0xe9   :  { %vm323_vm5 = vcmp.eq.s32.totalorder %v2368_v4, %v2398_v49  ;;  %vm304_vm6 = vcmp.lt.s32.totalorder %v302_v48, %v303_v50  ;;  %vm321_vm7 = vcmp.eq.s32.totalorder %v2365_v3, %v2398_v49  ;;  %vm319_vm8 = vcmp.eq.s32.totalorder %v2362_v2, %v2398_v49 }
  0xea   :  { %1784 = vmatpush.msk.msra.mxu2 %vm323_vm5, %v3098_v51  ;;  %v305_v52 = vsel %vm304_vm6, %v302_v48, %v303_v50  ;;  %vm317_vm10 = vcmp.eq.s32.totalorder %v2359_v62, %v2398_v49  ;;  %vm315_vm12 = vcmp.eq.s32.totalorder %v2356_v61, %v2398_v49  ;;  %vm313_vm14 = vcmp.eq.s32.totalorder %v2353_v60, %v2398_v49 }
  0xeb   :  { %v306_v53 = vrot.slane %v305_v52, 1  ;;  %vm311_vm1 = vcmp.eq.s32.totalorder %v2350_v59, %v2398_v49  ;;  %vm309_vm4 = vcmp.eq.s32.totalorder %v2347_v54, %v2398_v49 }
  0xec   :  { %1785 = vmatpush.msk.msra.mxu2 %vm321_vm7, %v3098_v51  ;;  %v495_v47 = vpop.permute.xlu1 %494 }
  0xed   :  { %vm307_vm9 = vcmp.lt.s32.totalorder %v305_v52, %v306_v53 }
  0xee   :  { %1786 = vmatpush.msk.msra.mxu2 %vm319_vm8, %v3098_v51  ;;  %v2409_v55 = vsel %vm307_vm9, %v305_v52, %v306_v53 }
  0xef   :  { %vm324_vm11 = vcmp.eq.s32.totalorder %v2368_v4, %v2409_v55  ;;  %vm322_vm13 = vcmp.eq.s32.totalorder %v2365_v3, %v2409_v55  ;;  %vm320_vm15 = vcmp.eq.s32.totalorder %v2362_v2, %v2409_v55  ;;  %vm318_vm2 = vcmp.eq.s32.totalorder %v2359_v62, %v2409_v55 }
  0xf0   :  { %1787 = vmatpush.msk.msra.mxu2 %vm317_vm10, %v3098_v51  ;;  %1796 = vmatpush.msk.msra.mxu3 %vm324_vm11, %v3098_v51  ;;  %vm316_vm5 = vcmp.eq.s32.totalorder %v2356_v61, %v2409_v55  ;;  %vm314_vm6 = vcmp.eq.s32.totalorder %v2353_v60, %v2409_v55  ;;  %vm312_vm7 = vcmp.eq.s32.totalorder %v2350_v59, %v2409_v55 }
  0xf1   :  { %vm310_vm8 = vcmp.eq.s32.totalorder %v2347_v54, %v2409_v55 }
  0xf2   :  { %1788 = vmatpush.msk.msra.mxu2 %vm315_vm12, %v3098_v51  ;;  %1797 = vmatpush.msk.msra.mxu3 %vm322_vm13, %v3098_v51 }
  0xf4   :  { %1789 = vmatpush.msk.msra.mxu2 %vm313_vm14, %v3098_v51  ;;  %1798 = vmatpush.msk.msra.mxu3 %vm320_vm15, %v3098_v51 }
  0xf6   :  { %1790 = vmatpush.msk.msra.mxu2 %vm311_vm1, %v3098_v51  ;;  %1799 = vmatpush.msk.msra.mxu3 %vm318_vm2, %v3098_v51 }
  0xf8   :  { %1791 = vmatpush.msk.msra.mxu2 %vm309_vm4, %v3098_v51  ;;  %1800 = vmatpush.msk.msra.mxu3 %vm316_vm5, %v3098_v51 }
  0xf9   :  { %1792 = vmatmul.msk.f32.vlgmr.msra.gmra.mxu2 %vm357_vm3, %v54_v56 }
  0xfa   :  { %1801 = vmatpush.msk.msra.mxu3 %vm314_vm6, %v3098_v51 }
  0xfc   :  { %1802 = vmatpush.msk.msra.mxu3 %vm312_vm7, %v3098_v51 }
  0xfe   :  { %1803 = vmatpush.msk.msra.mxu3 %vm310_vm8, %v3098_v51 }
  0xff   :  { %1804 = vmatmul.msk.f32.vlgmr.msra.gmra.mxu3 %vm357_vm3, %v54_v56  ;;  %v500_v56 = vpop.permute.xlu2 %499 }
 0x101   :  { %1793 = vmatmul.msk.f32.gmra.mxu2 %vm357_vm3, %v55_v57 }
 0x107   :  { %1805 = vmatmul.msk.f32.gmra.mxu3 %vm357_vm3, %v55_v57 }
 0x109   :  { %1794 = vmatmul.msk.f32.gmra.mxu2 %vm357_vm3, %v56_v58 }
 0x10f   :  { %1806 = vmatmul.msk.f32.gmra.mxu3 %vm357_vm3, %v56_v58 }
 0x111   :  { %1795 = vmatmul.msk.f32.gmra.mxu2 %vm357_vm3, %v57_v63 }
 0x117   :  { %1807 = vmatmul.msk.f32.gmra.mxu3 %vm357_vm3, %v57_v63 }
 0x17c   :  { %v2470_v9 = vpop.f32.mrf.mxu2 }
 0x182   :  { %v2472_v16 = vpop.f32.mrf.mxu3 }
 0x184   :  { %v2474_v25 = vpop.f32.mrf.mxu2 }
 0x185   :  { %v2496_v19 = vsub.f32 %v2164_v7, %v2474_v25 }
 0x18a   :  { %v2476_v26 = vpop.f32.mrf.mxu3 }
 0x18c   :  { %v2478_v27 = vpop.f32.mrf.mxu2 }
 0x18d   :  { %v2491_v14 = vsub.f32 %v2152_v5, %v2478_v27 }
 0x192   :  { %v2480_v28 = vpop.f32.mrf.mxu3 }
 0x193   :  { %v2516_v7 = vsub.f32 %v2157_v6, %v2480_v28  ;;  %v1810_v6 = vld [vmem:[%s3093_s1 + $0x50] sm:$0xff] }
 0x194   :  { %v2482_v17 = vpop.f32.mrf.mxu2 }
 0x195   :  { %3110 = vst [vmem:[#allocation8_spill] sm:$0xff] %v2482_v17  ;;  %v2486_v12 = vsub.f32 %v2136_v0, %v2482_v17  ;;  %v2503_v0 = vsub.f32 %v2179_v10, %v2470_v9  ;;  %v2522_v10 = vsub.f32 %v2169_v8, %v2476_v26  ;;  %v1811_v8 = vld [vmem:[%s3093_s1 + $0x58] sm:$0xff] }
 0x197   :  { %543 = vmatpush.msrb.mxu2 %v2486_v12 }
 0x199   :  { %544 = vmatpush.msrb.mxu2 %v2491_v14 }
 0x19a   :  { %v2498_v21 = vpop.f32.mrf.mxu3 }
 0x19b   :  { %3111 = vst [vmem:[#allocation9_spill] sm:$0xff] %v2498_v21  ;;  %545 = vmatpush.msrb.mxu2 %v2496_v19  ;;  %v2510_v5 = vsub.f32 %v2141_v1, %v2498_v21  ;;  %v2527_v1 = vsub.f32 %v2184_v11, %v2472_v16  ;;  %v1812_v11 = vld [vmem:[%s3093_s1 + $0x60] sm:$0xff] }
 0x19d   :  { %546 = vmatpush.msrb.mxu2 %v2503_v0  ;;  %584 = vmatpush.msrb.mxu3 %v2510_v5 }
 0x19e   :  { %1828 = vmatmul.msk.f32.vlgmr.msrb.gmra.mxu2 %vm98_vm0, %v1808_v23 }
 0x19f   :  { %585 = vmatpush.msrb.mxu3 %v2516_v7 }
 0x1a1   :  { %586 = vmatpush.msrb.mxu3 %v2522_v10 }
 0x1a3   :  { %587 = vmatpush.msrb.mxu3 %v2527_v1 }
 0x1a4   :  { %1836 = vmatmul.msk.f32.vlgmr.msrb.gmra.mxu3 %vm98_vm0, %v1808_v23 }
 0x1a6   :  { %1829 = vmatmul.msk.f32.gmra.mxu2 %vm98_vm0, %v1809_v29 }
 0x1ac   :  { %1837 = vmatmul.msk.f32.gmra.mxu3 %vm98_vm0, %v1809_v29  ;;  %v505_v29 = vpop.permute.xlu0 %504 }
 0x1ae   :  { %1830 = vmatmul.msk.f32.gmra.mxu2 %vm98_vm0, %v1810_v6 }
 0x1b4   :  { %1838 = vmatmul.msk.f32.gmra.mxu3 %vm98_vm0, %v1810_v6 }
 0x1b6   :  { %1831 = vmatmul.msk.f32.gmra.mxu2 %vm98_vm0, %v1811_v8 }
 0x1bc   :  { %1839 = vmatmul.msk.f32.gmra.mxu3 %vm98_vm0, %v1811_v8 }
 0x1be   :  { %1832 = vmatmul.msk.f32.gmra.mxu2 %vm98_vm0, %v1812_v11 }
 0x1c4   :  { %1840 = vmatmul.msk.f32.gmra.mxu3 %vm98_vm0, %v1812_v11 }
 0x1c6   :  { %1833 = vmatmul.msk.f32.gmra.mxu2 %vm98_vm0, %v1813_v30 }
 0x1cc   :  { %1841 = vmatmul.msk.f32.gmra.mxu3 %vm98_vm0, %v1813_v30 }
 0x1ce   :  { %1834 = vmatmul.msk.f32.gmra.mxu2 %vm98_vm0, %v1814_v18 }
 0x1d4   :  { %1842 = vmatmul.msk.f32.gmra.mxu3 %vm98_vm0, %v1814_v18 }
 0x1d6   :  { %1835 = vmatmul.msk.f32.gmra.mxu2 %vm98_vm0, %v1815_v31 }
 0x1dc   :  { %1843 = vmatmul.msk.f32.gmra.mxu3 %vm98_vm0, %v1815_v31 }
 0x221   :  { %v548_v22 = vpop.f32.mrf.mxu2 }
 0x222   :  { %v549_v48 = vadd.f32 %v548_v22, %v470_v38 }
 0x227   :  { %v589_v33 = vpop.f32.mrf.mxu3 }
 0x228   :  { %v2570_v22 = vadd.f32 %v589_v33, %v470_v38 }
 0x229   :  { %v551_v13 = vpop.f32.mrf.mxu2 }
 0x22a   :  { %v552_v50 = vadd.f32 %v551_v13, %v475_v32 }
 0x22f   :  { %v592_v15 = vpop.f32.mrf.mxu3 }
 0x230   :  { %v2572_v13 = vadd.f32 %v592_v15, %v475_v32 }
 0x231   :  { %v554_v20 = vpop.f32.mrf.mxu2 }
 0x232   :  { %v555_v45 = vadd.f32 %v554_v20, %v480_v41 }
 0x234   :  { %v613_v57 = vmax.f32 %v549_v48, %v555_v45 }
 0x237   :  { %v595_v34 = vpop.f32.mrf.mxu3 }
 0x238   :  { %v2566_v18 = vadd.f32 %v595_v34, %v480_v41 }
 0x239   :  { %v557_v35 = vpop.f32.mrf.mxu2 }
 0x23a   :  { %v558_v46 = vadd.f32 %v557_v35, %v485_v42 }
 0x23c   :  { %v614_v58 = vmax.f32 %v552_v50, %v558_v46 }
 0x23f   :  { %v598_v36 = vpop.f32.mrf.mxu3 }
 0x240   :  { %v2568_v31 = vadd.f32 %v598_v36, %v485_v42 }
 0x241   :  { %v560_v37 = vpop.f32.mrf.mxu2 }
 0x242   :  { %v561_v52 = vadd.f32 %v560_v37, %v490_v43  ;;  %v627_v34 = vmax.f32 %v2572_v13, %v2568_v31 }
 0x244   :  { %v615_v8 = vmax.f32 %v613_v57, %v561_v52  ;;  %v626_v57 = vmax.f32 %v2570_v22, %v2566_v18 }
 0x247   :  { %v601_v39 = vpop.f32.mrf.mxu3 }
 0x248   :  { %v2574_v37 = vadd.f32 %v601_v39, %v490_v43 }
 0x249   :  { %v563_v40 = vpop.f32.mrf.mxu2 }
 0x24a   :  { %v564_v53 = vadd.f32 %v563_v40, %v495_v47  ;;  %v628_v33 = vmax.f32 %v626_v57, %v2574_v37 }
 0x24c   :  { %v616_v11 = vmax.f32 %v614_v58, %v564_v53 }
 0x24f   :  { %v604_v44 = vpop.f32.mrf.mxu3 }
 0x250   :  { %v2576_v40 = vadd.f32 %v604_v44, %v495_v47 }
 0x251   :  { %v566_v24 = vpop.f32.mrf.mxu2 }
 0x252   :  { %v567_v63 = vadd.f32 %v566_v24, %v500_v56  ;;  %v629_v15 = vmax.f32 %v627_v34, %v2576_v40 }
 0x254   :  { %v617_v20 = vmax.f32 %v615_v8, %v567_v63 }
 0x257   :  { %v607_v23 = vpop.f32.mrf.mxu3 }
 0x258   :  { %v2582_v41 = vadd.f32 %v607_v23, %v500_v56 }
 0x259   :  { %v569_v6 = vpop.f32.mrf.mxu2 }
 0x25a   :  { %v570_v30 = vadd.f32 %v569_v6, %v505_v29  ;;  %v630_v39 = vmax.f32 %v628_v33, %v2582_v41 }
 0x25c   :  { %v618_v35 = vmax.f32 %v616_v11, %v570_v30 }
 0x25e   :  { %v619_v24 = vmax.f32 %v617_v20, %v618_v35 }
 0x25f   :  { %v610_v42 = vpop.f32.mrf.mxu3 }
 0x260   :  { %v620_v36 = vrot.slane %v619_v24, 4  ;;  %v2586_v38 = vadd.f32 %v610_v42, %v505_v29 }
 0x262   :  { %v621_v32 = vmax.f32 %v619_v24, %v620_v36  ;;  %v631_v43 = vmax.f32 %v629_v15, %v2586_v38 }
 0x264   :  { %v622_v44 = vrot.slane %v621_v32, 2  ;;  %v632_v47 = vmax.f32 %v630_v39, %v631_v43 }
 0x266   :  { %v623_v58 = vmax.f32 %v621_v32, %v622_v44  ;;  %v633_v6 = vrot.slane %v632_v47, 4 }
 0x268   :  { %v624_v8 = vrot.slane %v623_v58, 1  ;;  %v634_v56 = vmax.f32 %v632_v47, %v633_v6 }
 0x26a   :  { %v625_v23 = vmax.f32 %v623_v58, %v624_v8  ;;  %v635_v11 = vrot.slane %v634_v56, 2 }
 0x26c   :  { %vm639_vm9 = vcmp.eq.f32.partialorder %v549_v48, %v625_v23  ;;  %vm641_vm10 = vcmp.eq.f32.partialorder %v552_v50, %v625_v23  ;;  %vm643_vm11 = vcmp.eq.f32.partialorder %v555_v45, %v625_v23  ;;  %vm645_vm12 = vcmp.eq.f32.partialorder %v558_v46, %v625_v23 }
 0x26d   :  { %vm647_vm13 = vcmp.eq.f32.partialorder %v561_v52, %v625_v23  ;;  %vm649_vm14 = vcmp.eq.f32.partialorder %v564_v53, %v625_v23  ;;  %v655_v29 = vsel %vm639_vm9, %v2347_v54, 64  ;;  %v657_v20 = vsel %vm641_vm10, %v2350_v59, 64 }
 0x26e   :  { %v659_v35 = vsel %vm643_vm11, %v2353_v60, 64  ;;  %v661_v24 = vsel %vm645_vm12, %v2356_v61, 64  ;;  %vm651_vm15 = vcmp.eq.f32.partialorder %v567_v63, %v625_v23  ;;  %vm653_vm1 = vcmp.eq.f32.partialorder %v570_v30, %v625_v23 }
 0x26f   :  { %vm671_vm2 = vcmp.lt.s32.totalorder %v655_v29, %v659_v35  ;;  %vm673_vm4 = vcmp.lt.s32.totalorder %v657_v20, %v661_v24  ;;  %v636_v57 = vmax.f32 %v634_v56, %v635_v11  ;;  %v663_v48 = vsel %vm647_vm13, %v2359_v62, 64 }
 0x270   :  { %v665_v45 = vsel %vm649_vm14, %v2362_v2, 64  ;;  %v672_v46 = vsel %vm671_vm2, %v655_v29, %v659_v35  ;;  %v674_v50 = vsel %vm673_vm4, %v657_v20, %v661_v24  ;;  %v667_v53 = vsel %vm651_vm15, %v2365_v3, 64 }
 0x271   :  { %vm675_vm5 = vcmp.lt.s32.totalorder %v672_v46, %v663_v48  ;;  %vm677_vm6 = vcmp.lt.s32.totalorder %v674_v50, %v665_v45  ;;  %v637_v52 = vrot.slane %v636_v57, 1  ;;  %v669_v34 = vsel %vm653_vm1, %v2368_v4, 64 }
 0x272   :  { %v676_v36 = vsel %vm675_vm5, %v672_v46, %v663_v48  ;;  %v678_v42 = vsel %vm677_vm6, %v674_v50, %v665_v45  ;;  %v1824_v50 = vld [vmem:[%s3095_s3 + $0x20] sm:$0xff] }
 0x273   :  { %vm679_vm7 = vcmp.lt.s32.totalorder %v676_v36, %v667_v53  ;;  %vm681_vm8 = vcmp.lt.s32.totalorder %v678_v42, %v669_v34  ;;  %v638_v63 = vmax.f32 %v636_v57, %v637_v52  ;;  %v1825_v52 = vld [vmem:[%s3095_s3 + $0x28] sm:$0xff] }
 0x274   :  { %v680_v30 = vsel %vm679_vm7, %v676_v36, %v667_v53  ;;  %v682_v33 = vsel %vm681_vm8, %v678_v42, %v669_v34  ;;  %v1826_v53 = vld [vmem:[%s3095_s3 + $0x30] sm:$0xff]  ;;  %v1827_v34 = vld [vmem:[%s3095_s3 + $0x38] sm:$0xff] }
 0x275   :  { %vm683_vm9 = vcmp.lt.s32.totalorder %v680_v30, %v682_v33  ;;  %vm640_vm10 = vcmp.eq.f32.partialorder %v2570_v22, %v638_v63  ;;  %vm642_vm11 = vcmp.eq.f32.partialorder %v2572_v13, %v638_v63  ;;  %vm644_vm12 = vcmp.eq.f32.partialorder %v2566_v18, %v638_v63 }
 0x276   :  { %v684_v15 = vsel %vm683_vm9, %v680_v30, %v682_v33  ;;  %vm646_vm13 = vcmp.eq.f32.partialorder %v2568_v31, %v638_v63  ;;  %vm648_vm14 = vcmp.eq.f32.partialorder %v2574_v37, %v638_v63  ;;  %v656_v39 = vsel %vm640_vm10, %v2347_v54, 64 }
 0x277   :  { %v685_v32 = vrot.slane %v684_v15, 4  ;;  %vm650_vm15 = vcmp.eq.f32.partialorder %v2576_v40, %v638_v63  ;;  %v658_v43 = vsel %vm642_vm11, %v2350_v59, 64  ;;  %v660_v44 = vsel %vm644_vm12, %v2353_v60, 64 }
 0x278   :  { %v662_v22 = vsel %vm646_vm13, %v2356_v61, 64  ;;  %vm652_vm2 = vcmp.eq.f32.partialorder %v2582_v41, %v638_v63  ;;  %vm654_vm4 = vcmp.eq.f32.partialorder %v2586_v38, %v638_v63  ;;  %v664_v31 = vsel %vm648_vm14, %v2359_v62, 64 }
 0x279   :  { %vm686_vm1 = vcmp.lt.s32.totalorder %v684_v15, %v685_v32  ;;  %vm694_vm5 = vcmp.lt.s32.totalorder %v656_v39, %v660_v44  ;;  %vm696_vm6 = vcmp.lt.s32.totalorder %v658_v43, %v662_v22  ;;  %v666_v37 = vsel %vm650_vm15, %v2362_v2, 64 }
 0x27a   :  { %v687_v18 = vsel %vm686_vm1, %v684_v15, %v685_v32  ;;  %v695_v40 = vsel %vm694_vm5, %v656_v39, %v660_v44  ;;  %v697_v47 = vsel %vm696_vm6, %v658_v43, %v662_v22  ;;  %v668_v58 = vsel %vm652_vm2, %v2365_v3, 64 }
 0x27b   :  { %v688_v13 = vrot.slane %v687_v18, 2  ;;  %vm698_vm7 = vcmp.lt.s32.totalorder %v695_v40, %v664_v31  ;;  %vm700_vm8 = vcmp.lt.s32.totalorder %v697_v47, %v666_v37  ;;  %v670_v6 = vsel %vm654_vm4, %v2368_v4, 64 }
 0x27c   :  { %v699_v41 = vsel %vm698_vm7, %v695_v40, %v664_v31  ;;  %v701_v8 = vsel %vm700_vm8, %v697_v47, %v666_v37  ;;  %v1890_v37 = vld [vmem:[%s3093_s1 + $0xb0] sm:$0xff]  ;;  %v1891_v40 = vld [vmem:[%s3093_s1 + $0xb8] sm:$0xff] }
 0x27d   :  { %vm689_vm9 = vcmp.lt.s32.totalorder %v687_v18, %v688_v13  ;;  %vm702_vm10 = vcmp.lt.s32.totalorder %v699_v41, %v668_v58  ;;  %vm704_vm11 = vcmp.lt.s32.totalorder %v701_v8, %v670_v6 }
 0x27e   :  { %v690_v38 = vsel %vm689_vm9, %v687_v18, %v688_v13  ;;  %v703_v23 = vsel %vm702_vm10, %v699_v41, %v668_v58  ;;  %v705_v11 = vsel %vm704_vm11, %v701_v8, %v670_v6  ;;  %v1885_v18 = vld [vmem:[%s3093_s1 + $0x88] sm:$0xff] }
 0x27f   :  { %v691_v56 = vrot.slane %v690_v38, 1  ;;  %vm706_vm12 = vcmp.lt.s32.totalorder %v703_v23, %v705_v11  ;;  %v1889_v13 = vld [vmem:[%s3093_s1 + $0xa8] sm:$0xff] }
 0x280   :  { %v707_v29 = vsel %vm706_vm12, %v703_v23, %v705_v11  ;;  %v893_v11 = vpop.permute.xlu1 %892 }
 0x281   :  { %vm692_vm13 = vcmp.lt.s32.totalorder %v690_v38, %v691_v56  ;;  %v708_v35 = vrot.slane %v707_v29, 4 }
 0x282   :  { %v2614_v20 = vsel %vm692_vm13, %v690_v38, %v691_v56 }
 0x283   :  { %vm731_vm14 = vcmp.eq.s32.totalorder %v2368_v4, %v2614_v20  ;;  %vm709_vm15 = vcmp.lt.s32.totalorder %v707_v29, %v708_v35  ;;  %vm729_vm1 = vcmp.eq.s32.totalorder %v2365_v3, %v2614_v20  ;;  %vm727_vm2 = vcmp.eq.s32.totalorder %v2362_v2, %v2614_v20 }
 0x284   :  { %1860 = vmatpush.msk.msrb.mxu0 %vm731_vm14, %v3098_v51  ;;  %v710_v24 = vsel %vm709_vm15, %v707_v29, %v708_v35  ;;  %vm725_vm5 = vcmp.eq.s32.totalorder %v2359_v62, %v2614_v20  ;;  %vm723_vm6 = vcmp.eq.s32.totalorder %v2356_v61, %v2614_v20  ;;  %vm721_vm8 = vcmp.eq.s32.totalorder %v2353_v60, %v2614_v20  ;;  %v898_v35 = vpop.permute.xlu2 %897 }
 0x285   :  { %v711_v57 = vrot.slane %v710_v24, 2  ;;  %vm719_vm10 = vcmp.eq.s32.totalorder %v2350_v59, %v2614_v20  ;;  %vm717_vm12 = vcmp.eq.s32.totalorder %v2347_v54, %v2614_v20 }
 0x286   :  { %1861 = vmatpush.msk.msrb.mxu0 %vm729_vm1, %v3098_v51 }
 0x287   :  { %vm712_vm4 = vcmp.lt.s32.totalorder %v710_v24, %v711_v57 }
 0x288   :  { %1862 = vmatpush.msk.msrb.mxu0 %vm727_vm2, %v3098_v51  ;;  %v713_v48 = vsel %vm712_vm4, %v710_v24, %v711_v57  ;;  %v903_v57 = vpop.permute.xlu0 %902 }
 0x289   :  { %v714_v45 = vrot.slane %v713_v48, 1 }
 0x28a   :  { %1863 = vmatpush.msk.msrb.mxu0 %vm725_vm5, %v3098_v51 }
 0x28b   :  { %vm715_vm7 = vcmp.lt.s32.totalorder %v713_v48, %v714_v45 }
 0x28c   :  { %1864 = vmatpush.msk.msrb.mxu0 %vm723_vm6, %v3098_v51  ;;  %v2631_v46 = vsel %vm715_vm7, %v713_v48, %v714_v45  ;;  %v908_v45 = vpop.permute.xlu1 %907 }
 0x28d   :  { %vm732_vm9 = vcmp.eq.s32.totalorder %v2368_v4, %v2631_v46  ;;  %vm730_vm11 = vcmp.eq.s32.totalorder %v2365_v3, %v2631_v46  ;;  %vm728_vm13 = vcmp.eq.s32.totalorder %v2362_v2, %v2631_v46  ;;  %vm726_vm14 = vcmp.eq.s32.totalorder %v2359_v62, %v2631_v46 }
 0x28e   :  { %1865 = vmatpush.msk.msrb.mxu0 %vm721_vm8, %v3098_v51  ;;  %1872 = vmatpush.msk.msrb.mxu1 %vm732_vm9, %v3098_v51  ;;  %vm724_vm15 = vcmp.eq.s32.totalorder %v2356_v61, %v2631_v46  ;;  %vm722_vm1 = vcmp.eq.s32.totalorder %v2353_v60, %v2631_v46  ;;  %vm720_vm2 = vcmp.eq.s32.totalorder %v2350_v59, %v2631_v46 }
 0x28f   :  { %vm718_vm4 = vcmp.eq.s32.totalorder %v2347_v54, %v2631_v46 }
 0x290   :  { %1866 = vmatpush.msk.msrb.mxu0 %vm719_vm10, %v3098_v51  ;;  %1873 = vmatpush.msk.msrb.mxu1 %vm730_vm11, %v3098_v51 }
 0x292   :  { %1867 = vmatpush.msk.msrb.mxu0 %vm717_vm12, %v3098_v51  ;;  %1874 = vmatpush.msk.msrb.mxu1 %vm728_vm13, %v3098_v51 }
 0x293   :  { %1868 = vmatmul.msk.f32.vlgmr.msrb.gmra.mxu0 %vm357_vm3, %v1824_v50 }
 0x294   :  { %1875 = vmatpush.msk.msrb.mxu1 %vm726_vm14, %v3098_v51 }
 0x296   :  { %1876 = vmatpush.msk.msrb.mxu1 %vm724_vm15, %v3098_v51 }
 0x298   :  { %1877 = vmatpush.msk.msrb.mxu1 %vm722_vm1, %v3098_v51 }
 0x29a   :  { %1878 = vmatpush.msk.msrb.mxu1 %vm720_vm2, %v3098_v51 }
 0x29b   :  { %1869 = vmatmul.msk.f32.gmra.mxu0 %vm357_vm3, %v1825_v52 }
 0x29c   :  { %1879 = vmatpush.msk.msrb.mxu1 %vm718_vm4, %v3098_v51 }
 0x29d   :  { %1880 = vmatmul.msk.f32.vlgmr.msrb.gmra.mxu1 %vm357_vm3, %v1824_v50  ;;  %v913_v50 = vpop.permute.xlu2 %912 }
 0x2a3   :  { %1870 = vmatmul.msk.f32.gmra.mxu0 %vm357_vm3, %v1826_v53 }
 0x2a5   :  { %1881 = vmatmul.msk.f32.gmra.mxu1 %vm357_vm3, %v1825_v52  ;;  %v928_v21 = vpop.permute.xlu2 %927 }
 0x2ab   :  { %1871 = vmatmul.msk.f32.gmra.mxu0 %vm357_vm3, %v1827_v34 }
 0x2ad   :  { %1882 = vmatmul.msk.f32.gmra.mxu1 %vm357_vm3, %v1826_v53 }
 0x2b5   :  { %1883 = vmatmul.msk.f32.gmra.mxu1 %vm357_vm3, %v1827_v34 }
 0x310   :  { %v2686_v36 = vpop.f32.mrf.mxu0 }
 0x311   :  { %v2716_v22 = vsub.f32 %v2503_v0, %v2686_v36 }
 0x313   :  { %3114 = vst [vmem:[#allocation12_spill] sm:$0xff] %v2716_v22 }
 0x318   :  { %v2688_v42 = vpop.f32.mrf.mxu0 }
 0x319   :  { %v2711_v44 = vsub.f32 %v2496_v19, %v2688_v42 }
 0x31a   :  { %v2690_v63 = vpop.f32.mrf.mxu1 }
 0x31b   :  { %3113 = vst [vmem:[#allocation11_spill] sm:$0xff] %v2711_v44 }
 0x320   :  { %v2692_v30 = vpop.f32.mrf.mxu0 }
 0x321   :  { %v2704_v39 = vsub.f32 %v2491_v14, %v2692_v30 }
 0x322   :  { %v2694_v33 = vpop.f32.mrf.mxu1 }
 0x323   :  { %v2740_v31 = vsub.f32 %v2522_v10, %v2694_v33  ;;  %v1887_v10 = vld [vmem:[%s3093_s1 + $0x98] sm:$0xff] }
 0x325   :  { %3118 = vst [vmem:[#allocation16_spill] sm:$0xff] %v2740_v31 }
 0x328   :  { %v2696_v15 = vpop.f32.mrf.mxu0 }
 0x329   :  { %3112 = vst [vmem:[#allocation10_spill] sm:$0xff] %v2696_v15  ;;  %v2700_v32 = vsub.f32 %v2486_v12, %v2696_v15  ;;  %v1884_v12 = vld [vmem:[%s3093_s1 + $0x80] sm:$0xff] }
 0x32a   :  { %v2706_v43 = vpop.f32.mrf.mxu1 }
 0x32b   :  { %966 = vmatpush.msra.mxu0 %v2700_v32  ;;  %v2732_v0 = vsub.f32 %v2516_v7, %v2706_v43  ;;  %v1886_v7 = vld [vmem:[%s3093_s1 + $0x90] sm:$0xff] }
 0x32d   :  { %967 = vmatpush.msra.mxu0 %v2704_v39  ;;  %3117 = vst [vmem:[#allocation15_spill] sm:$0xff] %v2732_v0 }
 0x32f   :  { %968 = vmatpush.msra.mxu0 %v2711_v44 }
 0x331   :  { %969 = vmatpush.msra.mxu0 %v2716_v22 }
 0x332   :  { %1904 = vmatmul.msk.f32.vlgmr.msra.gmra.mxu0 %vm98_vm0, %v1884_v12  ;;  %v2724_v14 = vpop.f32.mrf.mxu1 }
 0x333   :  { %3115 = vst [vmem:[#allocation13_spill] sm:$0xff] %v2724_v14  ;;  %v2728_v19 = vsub.f32 %v2510_v5, %v2724_v14  ;;  %v2745_v5 = vsub.f32 %v2527_v1, %v2690_v63  ;;  %v1888_v1 = vld [vmem:[%s3093_s1 + $0xa0] sm:$0xff] }
 0x335   :  { %3116 = vst [vmem:[#allocation14_spill] sm:$0xff] %v2728_v19  ;;  %1007 = vmatpush.msra.mxu1 %v2728_v19 }
 0x336   :  { %3119 = vst [vmem:[#allocation17_spill] sm:$0xff] %v2745_v5 }
 0x337   :  { %1008 = vmatpush.msra.mxu1 %v2732_v0 }
 0x339   :  { %1009 = vmatpush.msra.mxu1 %v2740_v31 }
 0x33a   :  { %1905 = vmatmul.msk.f32.gmra.mxu0 %vm98_vm0, %v1885_v18 }
 0x33b   :  { %1010 = vmatpush.msra.mxu1 %v2745_v5 }
 0x33c   :  { %1912 = vmatmul.msk.f32.vlgmr.msra.gmra.mxu1 %vm98_vm0, %v1884_v12 }
 0x342   :  { %1906 = vmatmul.msk.f32.gmra.mxu0 %vm98_vm0, %v1886_v7 }
 0x344   :  { %1913 = vmatmul.msk.f32.gmra.mxu1 %vm98_vm0, %v1885_v18  ;;  %v918_v18 = vpop.permute.xlu0 %917 }
 0x34a   :  { %1907 = vmatmul.msk.f32.gmra.mxu0 %vm98_vm0, %v1887_v10 }
 0x34c   :  { %1914 = vmatmul.msk.f32.gmra.mxu1 %vm98_vm0, %v1886_v7 }
 0x352   :  { %1908 = vmatmul.msk.f32.gmra.mxu0 %vm98_vm0, %v1888_v1 }
 0x354   :  { %1915 = vmatmul.msk.f32.gmra.mxu1 %vm98_vm0, %v1887_v10 }
 0x35a   :  { %1909 = vmatmul.msk.f32.gmra.mxu0 %vm98_vm0, %v1889_v13 }
 0x35c   :  { %1916 = vmatmul.msk.f32.gmra.mxu1 %vm98_vm0, %v1888_v1 }
 0x362   :  { %1910 = vmatmul.msk.f32.gmra.mxu0 %vm98_vm0, %v1890_v37 }
 0x364   :  { %1917 = vmatmul.msk.f32.gmra.mxu1 %vm98_vm0, %v1889_v13 }
 0x36a   :  { %1911 = vmatmul.msk.f32.gmra.mxu0 %vm98_vm0, %v1891_v40 }
 0x36c   :  { %1918 = vmatmul.msk.f32.gmra.mxu1 %vm98_vm0, %v1890_v37  ;;  %v923_v37 = vpop.permute.xlu1 %922 }
 0x374   :  { %1919 = vmatmul.msk.f32.gmra.mxu1 %vm98_vm0, %v1891_v40 }
 0x3af   :  { %v971_v47 = vpop.f32.mrf.mxu0 }
 0x3b0   :  { %v972_v7 = vadd.f32 %v971_v47, %v893_v11 }
 0x3b7   :  { %v974_v58 = vpop.f32.mrf.mxu0 }
 0x3b8   :  { %v975_v10 = vadd.f32 %v974_v58, %v898_v35 }
 0x3b9   :  { %v1012_v6 = vpop.f32.mrf.mxu1 }
 0x3ba   :  { %v2786_v58 = vadd.f32 %v1012_v6, %v893_v11 }
 0x3bf   :  { %v977_v41 = vpop.f32.mrf.mxu0 }
 0x3c0   :  { %v978_v53 = vadd.f32 %v977_v41, %v903_v57 }
 0x3c1   :  { %v1015_v8 = vpop.f32.mrf.mxu1 }
 0x3c2   :  { %v1036_v40 = vmax.f32 %v972_v7, %v978_v53 }
 0x3c7   :  { %v980_v38 = vpop.f32.mrf.mxu0 }
 0x3c8   :  { %v981_v34 = vadd.f32 %v980_v38, %v908_v45 }
 0x3c9   :  { %v1018_v56 = vpop.f32.mrf.mxu1 }
 0x3ca   :  { %v1037_v51 = vmax.f32 %v975_v10, %v981_v34  ;;  %v2782_v38 = vadd.f32 %v1018_v56, %v903_v57 }
 0x3cf   :  { %v983_v23 = vpop.f32.mrf.mxu0 }
 0x3d0   :  { %v984_v1 = vadd.f32 %v983_v23, %v913_v50  ;;  %v2788_v23 = vadd.f32 %v1015_v8, %v898_v35 }
 0x3d1   :  { %v1021_v29 = vpop.f32.mrf.mxu1 }
 0x3d2   :  { %v1038_v17 = vmax.f32 %v1036_v40, %v984_v1  ;;  %v2784_v44 = vadd.f32 %v1021_v29, %v908_v45 }
 0x3d7   :  { %v986_v24 = vpop.f32.mrf.mxu0 }
 0x3d8   :  { %v987_v13 = vadd.f32 %v986_v24, %v918_v18 }
 0x3d9   :  { %v1024_v48 = vpop.f32.mrf.mxu1 }
 0x3da   :  { %v1039_v5 = vmax.f32 %v1037_v51, %v987_v13  ;;  %v2790_v24 = vadd.f32 %v1024_v48, %v913_v50  ;;  %v1049_v51 = vmax.f32 %v2786_v58, %v2782_v38 }
 0x3df   :  { %v989_v52 = vpop.f32.mrf.mxu0 }
 0x3e0   :  { %v990_v14 = vadd.f32 %v989_v52, %v923_v37 }
 0x3e1   :  { %v1027_v12 = vpop.f32.mrf.mxu1 }
 0x3e2   :  { %v1040_v0 = vmax.f32 %v1038_v17, %v990_v14  ;;  %v2792_v52 = vadd.f32 %v1027_v12, %v918_v18  ;;  %v1050_v17 = vmax.f32 %v2788_v23, %v2784_v44 }
 0x3e4   :  { %v1052_v6 = vmax.f32 %v1050_v17, %v2792_v52 }
 0x3e7   :  { %v992_v15 = vpop.f32.mrf.mxu0 }
 0x3e8   :  { %v993_v31 = vadd.f32 %v992_v15, %v928_v21 }
 0x3e9   :  { %v1030_v19 = vpop.f32.mrf.mxu1 }
 0x3ea   :  { %v1041_v22 = vmax.f32 %v1039_v5, %v993_v31  ;;  %v2798_v15 = vadd.f32 %v1030_v19, %v923_v37  ;;  %v1051_v5 = vmax.f32 %v1049_v51, %v2790_v24 }
 0x3ec   :  { %v1042_v41 = vmax.f32 %v1040_v0, %v1041_v22  ;;  %v1053_v11 = vmax.f32 %v1051_v5, %v2798_v15 }
 0x3ee   :  { %v1043_v47 = vrot.slane %v1042_v41, 4 }
 0x3f0   :  { %v1044_v40 = vmax.f32 %v1042_v41, %v1043_v47 }
 0x3f1   :  { %v1033_v0 = vpop.f32.mrf.mxu1 }
 0x3f2   :  { %v1045_v22 = vrot.slane %v1044_v40, 2  ;;  %v2802_v8 = vadd.f32 %v1033_v0, %v928_v21 }
 0x3f4   :  { %v1046_v56 = vmax.f32 %v1044_v40, %v1045_v22  ;;  %v1054_v29 = vmax.f32 %v1052_v6, %v2802_v8 }
 0x3f6   :  { %v1047_v35 = vrot.slane %v1046_v56, 1  ;;  %v1055_v57 = vmax.f32 %v1053_v11, %v1054_v29 }
 0x3f8   :  { %v1048_v48 = vmax.f32 %v1046_v56, %v1047_v35  ;;  %v1056_v45 = vrot.slane %v1055_v57, 4 }
 0x3fa   :  { %vm1062_vm5 = vcmp.eq.f32.partialorder %v972_v7, %v1048_v48  ;;  %vm1064_vm6 = vcmp.eq.f32.partialorder %v975_v10, %v1048_v48  ;;  %vm1066_vm7 = vcmp.eq.f32.partialorder %v978_v53, %v1048_v48  ;;  %vm1068_vm8 = vcmp.eq.f32.partialorder %v981_v34, %v1048_v48 }
 0x3fb   :  { %vm1070_vm9 = vcmp.eq.f32.partialorder %v984_v1, %v1048_v48  ;;  %vm1072_vm10 = vcmp.eq.f32.partialorder %v987_v13, %v1048_v48  ;;  %v1078_v19 = vsel %vm1062_vm5, %v2347_v54, 64  ;;  %v1080_v21 = vsel %vm1064_vm6, %v2350_v59, 64 }
 0x3fc   :  { %v1082_v50 = vsel %vm1066_vm7, %v2353_v60, 64  ;;  %v1084_v12 = vsel %vm1068_vm8, %v2356_v61, 64  ;;  %vm1074_vm11 = vcmp.eq.f32.partialorder %v990_v14, %v1048_v48  ;;  %vm1076_vm12 = vcmp.eq.f32.partialorder %v993_v31, %v1048_v48 }
 0x3fd   :  { %vm1094_vm13 = vcmp.lt.s32.totalorder %v1078_v19, %v1082_v50  ;;  %vm1096_vm14 = vcmp.lt.s32.totalorder %v1080_v21, %v1084_v12  ;;  %v1057_v18 = vmax.f32 %v1055_v57, %v1056_v45  ;;  %v1086_v7 = vsel %vm1070_vm9, %v2359_v62, 64 }
 0x3fe   :  { %v1088_v53 = vsel %vm1072_vm10, %v2362_v2, 64  ;;  %v1095_v34 = vsel %vm1094_vm13, %v1078_v19, %v1082_v50  ;;  %v1097_v10 = vsel %vm1096_vm14, %v1080_v21, %v1084_v12  ;;  %v1090_v13 = vsel %vm1074_vm11, %v2365_v3, 64 }
 0x3ff   :  { %vm1098_vm15 = vcmp.lt.s32.totalorder %v1095_v34, %v1086_v7  ;;  %vm1100_vm1 = vcmp.lt.s32.totalorder %v1097_v10, %v1088_v53  ;;  %v1058_v1 = vrot.slane %v1057_v18, 2  ;;  %v1092_v37 = vsel %vm1076_vm12, %v2368_v4, 64 }
 0x400   :  { %v1099_v41 = vsel %vm1098_vm15, %v1095_v34, %v1086_v7  ;;  %v1101_v47 = vsel %vm1100_vm1, %v1097_v10, %v1088_v53  ;;  %v3120_v50 = vmov 1.0  }
 0x401   :  { %vm1102_vm2 = vcmp.lt.s32.totalorder %v1099_v41, %v1090_v13  ;;  %vm1104_vm4 = vcmp.lt.s32.totalorder %v1101_v47, %v1092_v37  ;;  %v1059_v14 = vmax.f32 %v1057_v18, %v1058_v1 }
 0x402   :  { %v1103_v31 = vsel %vm1102_vm2, %v1099_v41, %v1090_v13  ;;  %v1105_v40 = vsel %vm1104_vm4, %v1101_v47, %v1092_v37  ;;  %v1900_v13 = vld [vmem:[%s3095_s3 + $0x40] sm:$0xff]  ;;  %v1903_v47 = vld [vmem:[%s3095_s3 + $0x58] sm:$0xff] }
 0x403   :  { %vm1106_vm5 = vcmp.lt.s32.totalorder %v1103_v31, %v1105_v40  ;;  %v1060_v51 = vrot.slane %v1059_v14, 1 }
 0x404   :  { %v1107_v17 = vsel %vm1106_vm5, %v1103_v31, %v1105_v40 }
 0x405   :  { %v1108_v22 = vrot.slane %v1107_v17, 4  ;;  %v1061_v0 = vmax.f32 %v1059_v14, %v1060_v51  ;;  %v843_v14 = vadd.f32 %v2686_v36, %v2470_v9  ;;  %v845_v51 = vadd.f32 %v2688_v42, %v2474_v25 }
 0x406   :  { %v846_v36 = vadd.f32 %v2694_v33, %v2476_v26 }
 0x407   :  { %vm1109_vm6 = vcmp.lt.s32.totalorder %v1107_v17, %v1108_v22  ;;  %vm1063_vm7 = vcmp.eq.f32.partialorder %v2786_v58, %v1061_v0  ;;  %vm1065_vm8 = vcmp.eq.f32.partialorder %v2788_v23, %v1061_v0  ;;  %vm1067_vm9 = vcmp.eq.f32.partialorder %v2782_v38, %v1061_v0 }
 0x408   :  { %v1110_v5 = vsel %vm1109_vm6, %v1107_v17, %v1108_v22  ;;  %vm1069_vm10 = vcmp.eq.f32.partialorder %v2784_v44, %v1061_v0  ;;  %vm1071_vm11 = vcmp.eq.f32.partialorder %v2790_v24, %v1061_v0  ;;  %v1079_v56 = vsel %vm1063_vm7, %v2347_v54, 64 }
 0x409   :  { %v1111_v6 = vrot.slane %v1110_v5, 2  ;;  %vm1073_vm12 = vcmp.eq.f32.partialorder %v2792_v52, %v1061_v0  ;;  %v1081_v11 = vsel %vm1065_vm8, %v2350_v59, 64  ;;  %v1083_v29 = vsel %vm1067_vm9, %v2353_v60, 64 }
 0x40a   :  { %v1085_v58 = vsel %vm1069_vm10, %v2356_v61, 64  ;;  %vm1075_vm14 = vcmp.eq.f32.partialorder %v2798_v15, %v1061_v0  ;;  %vm1077_vm15 = vcmp.eq.f32.partialorder %v2802_v8, %v1061_v0  ;;  %v1087_v44 = vsel %vm1071_vm11, %v2359_v62, 64 }
 0x40b   :  { %vm1112_vm13 = vcmp.lt.s32.totalorder %v1110_v5, %v1111_v6  ;;  %vm1117_vm1 = vcmp.lt.s32.totalorder %v1079_v56, %v1083_v29  ;;  %vm1119_vm2 = vcmp.lt.s32.totalorder %v1081_v11, %v1085_v58  ;;  %v1089_v24 = vsel %vm1073_vm12, %v2362_v2, 64 }
 0x40c   :  { %v1113_v38 = vsel %vm1112_vm13, %v1110_v5, %v1111_v6  ;;  %v1118_v52 = vsel %vm1117_vm1, %v1079_v56, %v1083_v29  ;;  %v1120_v35 = vsel %vm1119_vm2, %v1081_v11, %v1085_v58  ;;  %v1091_v57 = vsel %vm1075_vm14, %v2365_v3, 64 }
 0x40d   :  { %v1114_v23 = vrot.slane %v1113_v38, 1  ;;  %vm1121_vm4 = vcmp.lt.s32.totalorder %v1118_v52, %v1087_v44  ;;  %vm1123_vm5 = vcmp.lt.s32.totalorder %v1120_v35, %v1089_v24  ;;  %v1093_v48 = vsel %vm1077_vm15, %v2368_v4, 64 }
 0x40e   :  { %v1122_v15 = vsel %vm1121_vm4, %v1118_v52, %v1087_v44  ;;  %v1124_v45 = vsel %vm1123_vm5, %v1120_v35, %v1089_v24  ;;  %vm1705_vm9 = vcmask 1040384   ;;  %vm1708_vm11 = vcmask 1041408   ;;  %v3122_v44 = vld [vmem:[#allocation12_spill] sm:$0xff]  ;;  %v3124_v24 = vld [vmem:[#allocation15_spill] sm:$0xff] }
 0x40f   :  { %vm1115_vm6 = vcmp.lt.s32.totalorder %v1113_v38, %v1114_v23  ;;  %vm1125_vm7 = vcmp.lt.s32.totalorder %v1122_v15, %v1091_v57  ;;  %vm1127_vm8 = vcmp.lt.s32.totalorder %v1124_v45, %v1093_v48  ;;  %v1706_v18 = vsel %vm1705_vm9, %v2398_v49, %v2614_v20  ;;  %v3125_v35 = vld [vmem:[#allocation16_spill] sm:$0xff] }
 0x410   :  { %v1116_v8 = vsel %vm1115_vm6, %v1113_v38, %v1114_v23  ;;  %v1126_v19 = vsel %vm1125_vm7, %v1122_v15, %v1091_v57  ;;  %v1128_v21 = vsel %vm1127_vm8, %v1124_v45, %v1093_v48  ;;  %v1707_v37 = vsel %vm1705_vm9, %v2409_v55, %v2631_v46  ;;  %v1901_v55 = vld [vmem:[%s3095_s3 + $0x48] sm:$0xff]  ;;  %v1902_v46 = vld [vmem:[%s3095_s3 + $0x50] sm:$0xff]  ;;  %v1960_v23 = vld [vmem:[%s3093_s1 + $0xc0] sm:$0xff] }
 0x411   :  { %vm1154_vm10 = vcmp.eq.s32.totalorder %v2368_v4, %v1116_v8  ;;  %vm1129_vm12 = vcmp.lt.s32.totalorder %v1126_v19, %v1128_v21  ;;  %vm1152_vm13 = vcmp.eq.s32.totalorder %v2365_v3, %v1116_v8  ;;  %v2838_v53 = vsel %vm1708_vm11, %v1706_v18, %v1116_v8  ;;  %v3126_v48 = vld [vmem:[#allocation17_spill] sm:$0xff]  ;;  %v1967_v18 = vld [vmem:[%s3093_s1 + $0xf8] sm:$0xff] }
 0x412   :  { %1936 = vmatpush.msk.msra.mxu2 %vm1154_vm10, %v3120_v50  ;;  %v1130_v12 = vsel %vm1129_vm12, %v1126_v19, %v1128_v21  ;;  %vm1150_vm14 = vcmp.eq.s32.totalorder %v2362_v2, %v1116_v8  ;;  %vm1148_vm1 = vcmp.eq.s32.totalorder %v2359_v62, %v1116_v8  ;;  %vm1146_vm2 = vcmp.eq.s32.totalorder %v2356_v61, %v1116_v8  ;;  %v1962_v45 = vld [vmem:[%s3093_s1 + $0xd0] sm:$0xff]  ;;  %v1964_v19 = vld [vmem:[%s3093_s1 + $0xe0] sm:$0xff]  ;;  %v1965_v21 = vld [vmem:[%s3093_s1 + $0xe8] sm:$0xff] }
 0x413   :  { %v1131_v7 = vrot.slane %v1130_v12, 4  ;;  %vm1144_vm5 = vcmp.eq.s32.totalorder %v2353_v60, %v1116_v8  ;;  %vm1142_vm6 = vcmp.eq.s32.totalorder %v2350_v59, %v1116_v8  ;;  %vm1140_vm8 = vcmp.eq.s32.totalorder %v2347_v54, %v1116_v8  ;;  %v1963_v8 = vld [vmem:[%s3093_s1 + $0xd8] sm:$0xff] }
 0x414   :  { %1937 = vmatpush.msk.msra.mxu2 %vm1152_vm13, %v3120_v50  ;;  %v844_v0 = vadd.f32 %v2690_v63, %v2472_v16  ;;  %v847_v6 = vadd.f32 %v2692_v30, %v2478_v27  ;;  %v848_v27 = vadd.f32 %v2706_v43, %v2480_v28  ;;  %v3121_v30 = vld [vmem:[#allocation11_spill] sm:$0xff]  ;;  %v3123_v28 = vld [vmem:[#allocation14_spill] sm:$0xff]  ;;  %v1961_v43 = vld [vmem:[%s3093_s1 + $0xc8] sm:$0xff] }
 0x415   :  { %vm1132_vm15 = vcmp.lt.s32.totalorder %v1130_v12, %v1131_v7 }
 0x416   :  { %1938 = vmatpush.msk.msra.mxu2 %vm1150_vm14, %v3120_v50  ;;  %v1133_v34 = vsel %vm1132_vm15, %v1130_v12, %v1131_v7  ;;  %v1966_v12 = vld [vmem:[%s3093_s1 + $0xf0] sm:$0xff] }
 0x417   :  { %v1134_v10 = vrot.slane %v1133_v34, 2 }
 0x418   :  { %1939 = vmatpush.msk.msra.mxu2 %vm1148_vm1, %v3120_v50 }
 0x419   :  { %vm1135_vm4 = vcmp.lt.s32.totalorder %v1133_v34, %v1134_v10 }
 0x41a   :  { %1940 = vmatpush.msk.msra.mxu2 %vm1146_vm2, %v3120_v50  ;;  %v1136_v49 = vsel %vm1135_vm4, %v1133_v34, %v1134_v10 }
 0x41b   :  { %v1137_v20 = vrot.slane %v1136_v49, 1 }
 0x41c   :  { %1941 = vmatpush.msk.msra.mxu2 %vm1144_vm5, %v3120_v50 }
 0x41d   :  { %vm1138_vm7 = vcmp.lt.s32.totalorder %v1136_v49, %v1137_v20 }
 0x41e   :  { %1942 = vmatpush.msk.msra.mxu2 %vm1142_vm6, %v3120_v50  ;;  %v1139_v1 = vsel %vm1138_vm7, %v1136_v49, %v1137_v20 }
 0x41f   :  { %vm1155_vm10 = vcmp.eq.s32.totalorder %v2368_v4, %v1139_v1  ;;  %vm1153_vm12 = vcmp.eq.s32.totalorder %v2365_v3, %v1139_v1  ;;  %v2863_v41 = vsel %vm1708_vm11, %v1707_v37, %v1139_v1  ;;  %vm1151_vm13 = vcmp.eq.s32.totalorder %v2362_v2, %v1139_v1 }
 0x420   :  { %1943 = vmatpush.msk.msra.mxu2 %vm1140_vm8, %v3120_v50  ;;  %1948 = vmatpush.msk.msra.mxu3 %vm1155_vm10, %v3120_v50  ;;  %vm1149_vm14 = vcmp.eq.s32.totalorder %v2359_v62, %v1139_v1  ;;  %vm1147_vm9 = vcmp.eq.s32.totalorder %v2356_v61, %v1139_v1  ;;  %vm1145_vm11 = vcmp.eq.s32.totalorder %v2353_v60, %v1139_v1 }
 0x421   :  { %1944 = vmatmul.msk.f32.vlgmr.msra.gmra.mxu2 %vm357_vm3, %v1900_v13  ;;  %vm1143_vm15 = vcmp.eq.s32.totalorder %v2350_v59, %v1139_v1  ;;  %vm1141_vm1 = vcmp.eq.s32.totalorder %v2347_v54, %v1139_v1 }
 0x422   :  { %1949 = vmatpush.msk.msra.mxu3 %vm1153_vm12, %v3120_v50 }
 0x424   :  { %1950 = vmatpush.msk.msra.mxu3 %vm1151_vm13, %v3120_v50 }
 0x426   :  { %1951 = vmatpush.msk.msra.mxu3 %vm1149_vm14, %v3120_v50 }
 0x428   :  { %1952 = vmatpush.msk.msra.mxu3 %vm1147_vm9, %v3120_v50 }
 0x429   :  { %1945 = vmatmul.msk.f32.gmra.mxu2 %vm357_vm3, %v1901_v55 }
 0x42a   :  { %1953 = vmatpush.msk.msra.mxu3 %vm1145_vm11, %v3120_v50 }
 0x42c   :  { %1954 = vmatpush.msk.msra.mxu3 %vm1143_vm15, %v3120_v50 }
 0x42e   :  { %1955 = vmatpush.msk.msra.mxu3 %vm1141_vm1, %v3120_v50 }
 0x42f   :  { %1956 = vmatmul.msk.f32.vlgmr.msra.gmra.mxu3 %vm357_vm3, %v1900_v13 }
 0x431   :  { %1946 = vmatmul.msk.f32.gmra.mxu2 %vm357_vm3, %v1902_v46 }
 0x437   :  { %1957 = vmatmul.msk.f32.gmra.mxu3 %vm357_vm3, %v1901_v55  ;;  %v1316_v55 = vpop.permute.xlu0 %1315 }
 0x439   :  { %1947 = vmatmul.msk.f32.gmra.mxu2 %vm357_vm3, %v1903_v47 }
 0x43f   :  { %1958 = vmatmul.msk.f32.gmra.mxu3 %vm357_vm3, %v1902_v46  ;;  %v1321_v46 = vpop.permute.xlu1 %1320 }
 0x447   :  { %1959 = vmatmul.msk.f32.gmra.mxu3 %vm357_vm3, %v1903_v47 }
 0x4a4   :  { %v1217_v31 = vpop.f32.mrf.mxu2 }
 0x4a5   :  { %v2896_v40 = vadd.f32 %v1217_v31, %v843_v14  ;;  %v1282_v26 = vsub.f32 %v3122_v44, %v1217_v31  ;;  %v1326_v31 = vpop.permute.xlu2 %1325 }
 0x4ac   :  { %v1220_v17 = vpop.f32.mrf.mxu2 }
 0x4ad   :  { %v2900_v22 = vadd.f32 %v1220_v17, %v845_v51  ;;  %v1284_v58 = vsub.f32 %v3121_v30, %v1220_v17  ;;  %v1331_v51 = vpop.permute.xlu0 %1330  ;;  %v1336_v17 = vpop.permute.xlu1 %1335 }
 0x4b2   :  { %v1246_v5 = vpop.f32.mrf.mxu3 }
 0x4b3   :  { %v2906_v56 = vadd.f32 %v1246_v5, %v844_v0  ;;  %v1283_v15 = vsub.f32 %v3126_v48, %v1246_v5 }
 0x4b4   :  { %v1223_v11 = vpop.f32.mrf.mxu2 }
 0x4b5   :  { %v2908_v9 = vadd.f32 %v1223_v11, %v847_v6  ;;  %v1286_v63 = vsub.f32 %v2704_v39, %v1223_v11  ;;  %v1346_v30 = vpop.permute.xlu0 %1345 }
 0x4ba   :  { %v1249_v29 = vpop.f32.mrf.mxu3 }
 0x4bb   :  { %v2912_v25 = vadd.f32 %v1249_v29, %v846_v36  ;;  %v1285_v57 = vsub.f32 %v3125_v35, %v1249_v29  ;;  %v1341_v36 = vpop.permute.xlu2 %1340 }
 0x4bc   :  { %v2914_v42 = vpop.f32.mrf.mxu2 }
 0x4bd   :  { %v1288_v16 = vsub.f32 %v2700_v32, %v2914_v42 }
 0x4bf   :  { %1389 = vmatpush.msrb.mxu2 %v1288_v16 }
 0x4c1   :  { %1390 = vmatpush.msrb.mxu2 %v1286_v63 }
 0x4c2   :  { %v1252_v38 = vpop.f32.mrf.mxu3 }
 0x4c3   :  { %v2923_v33 = vadd.f32 %v1252_v38, %v848_v27  ;;  %1391 = vmatpush.msrb.mxu2 %v1284_v58  ;;  %v1287_v52 = vsub.f32 %v3124_v24, %v1252_v38 }
 0x4c5   :  { %1392 = vmatpush.msrb.mxu2 %v1282_v26 }
 0x4c6   :  { %1980 = vmatmul.msk.f32.vlgmr.msrb.gmra.mxu2 %vm98_vm0, %v1960_v23 }
 0x4ca   :  { %v2929_v32 = vpop.f32.mrf.mxu3 }
 0x4cb   :  { %v1289_v39 = vsub.f32 %v3123_v28, %v2929_v32 }
 0x4cd   :  { %1430 = vmatpush.msrb.mxu3 %v1289_v39 }
 0x4ce   :  { %1981 = vmatmul.msk.f32.gmra.mxu2 %vm98_vm0, %v1961_v43 }
 0x4cf   :  { %1431 = vmatpush.msrb.mxu3 %v1287_v52 }
 0x4d1   :  { %1432 = vmatpush.msrb.mxu3 %v1285_v57 }
 0x4d3   :  { %1433 = vmatpush.msrb.mxu3 %v1283_v15 }
 0x4d4   :  { %1988 = vmatmul.msk.f32.vlgmr.msrb.gmra.mxu3 %vm98_vm0, %v1960_v23  ;;  %v1351_v23 = vpop.permute.xlu1 %1350 }
 0x4d6   :  { %1982 = vmatmul.msk.f32.gmra.mxu2 %vm98_vm0, %v1962_v45 }
 0x4dc   :  { %1989 = vmatmul.msk.f32.gmra.mxu3 %vm98_vm0, %v1961_v43 }
 0x4de   :  { %1983 = vmatmul.msk.f32.gmra.mxu2 %vm98_vm0, %v1963_v8 }
 0x4e4   :  { %1990 = vmatmul.msk.f32.gmra.mxu3 %vm98_vm0, %v1962_v45 }
 0x4e6   :  { %1984 = vmatmul.msk.f32.gmra.mxu2 %vm98_vm0, %v1964_v19 }
 0x4ec   :  { %1991 = vmatmul.msk.f32.gmra.mxu3 %vm98_vm0, %v1963_v8 }
 0x4ee   :  { %1985 = vmatmul.msk.f32.gmra.mxu2 %vm98_vm0, %v1965_v21 }
 0x4f4   :  { %1992 = vmatmul.msk.f32.gmra.mxu3 %vm98_vm0, %v1964_v19 }
 0x4f6   :  { %1986 = vmatmul.msk.f32.gmra.mxu2 %vm98_vm0, %v1966_v12 }
 0x4fc   :  { %1993 = vmatmul.msk.f32.gmra.mxu3 %vm98_vm0, %v1965_v21 }
 0x4fe   :  { %1987 = vmatmul.msk.f32.gmra.mxu2 %vm98_vm0, %v1967_v18 }
 0x504   :  { %1994 = vmatmul.msk.f32.gmra.mxu3 %vm98_vm0, %v1966_v12 }
 0x50c   :  { %1995 = vmatmul.msk.f32.gmra.mxu3 %vm98_vm0, %v1967_v18 }
 0x549   :  { %v1394_v7 = vpop.f32.mrf.mxu2 }
 0x54a   :  { %v1395_v29 = vadd.f32 %v1394_v7, %v1316_v55 }
 0x551   :  { %v1397_v34 = vpop.f32.mrf.mxu2 }
 0x552   :  { %v1398_v16 = vadd.f32 %v1397_v34, %v1321_v46 }
 0x557   :  { %v1435_v10 = vpop.f32.mrf.mxu3 }
 0x558   :  { %v2980_v34 = vadd.f32 %v1435_v10, %v1316_v55 }
 0x559   :  { %v1400_v49 = vpop.f32.mrf.mxu2 }
 0x55a   :  { %v1401_v6 = vadd.f32 %v1400_v49, %v1326_v31 }
 0x55c   :  { %v1459_v38 = vmax.f32 %v1395_v29, %v1401_v6 }
 0x55f   :  { %v1438_v20 = vpop.f32.mrf.mxu3 }
 0x560   :  { %v2974_v21 = vadd.f32 %v1438_v20, %v1321_v46 }
 0x561   :  { %v1403_v1 = vpop.f32.mrf.mxu2 }
 0x562   :  { %v1404_v11 = vadd.f32 %v1403_v1, %v1331_v51 }
 0x564   :  { %v1460_v44 = vmax.f32 %v1398_v16, %v1404_v11 }
 0x567   :  { %v1441_v13 = vpop.f32.mrf.mxu3 }
 0x568   :  { %v2976_v12 = vadd.f32 %v1441_v13, %v1326_v31 }
 0x569   :  { %v1406_v37 = vpop.f32.mrf.mxu2 }
 0x56a   :  { %v1407_v63 = vadd.f32 %v1406_v37, %v1336_v17  ;;  %v1472_v20 = vmax.f32 %v2980_v34, %v2976_v12 }
 0x56c   :  { %v1461_v39 = vmax.f32 %v1459_v38, %v1407_v63 }
 0x56f   :  { %v1444_v47 = vpop.f32.mrf.mxu3 }
 0x570   :  { %v2972_v8 = vadd.f32 %v1444_v47, %v1331_v51 }
 0x571   :  { %v1409_v14 = vpop.f32.mrf.mxu2 }
 0x572   :  { %v1410_v27 = vadd.f32 %v1409_v14, %v1341_v36  ;;  %v1473_v49 = vmax.f32 %v2974_v21, %v2972_v8 }
 0x574   :  { %v1462_v43 = vmax.f32 %v1460_v44, %v1410_v27 }
 0x577   :  { %v1447_v0 = vpop.f32.mrf.mxu3 }
 0x578   :  { %v2984_v1 = vadd.f32 %v1447_v0, %v1336_v17 }
 0x579   :  { %v1412_v5 = vpop.f32.mrf.mxu2 }
 0x57a   :  { %v1413_v26 = vadd.f32 %v1412_v5, %v1346_v30  ;;  %v1474_v10 = vmax.f32 %v1472_v20, %v2984_v1 }
 0x57c   :  { %v1463_v52 = vmax.f32 %v1461_v39, %v1413_v26 }
 0x57f   :  { %v1450_v58 = vpop.f32.mrf.mxu3 }
 0x580   :  { %v2978_v18 = vadd.f32 %v1450_v58, %v1341_v36 }
 0x581   :  { %v1415_v28 = vpop.f32.mrf.mxu2 }
 0x582   :  { %v1416_v24 = vadd.f32 %v1415_v28, %v1351_v23  ;;  %v1475_v13 = vmax.f32 %v1473_v49, %v2978_v18 }
 0x584   :  { %v1464_v35 = vmax.f32 %v1462_v43, %v1416_v24 }
 0x586   :  { %v1465_v57 = vmax.f32 %v1463_v52, %v1464_v35 }
 0x587   :  { %v1453_v48 = vpop.f32.mrf.mxu3 }
 0x588   :  { %v1466_v15 = vrot.slane %v1465_v57, 4  ;;  %v2991_v46 = vadd.f32 %v1453_v48, %v1346_v30 }
 0x58a   :  { %v1467_v45 = vmax.f32 %v1465_v57, %v1466_v15  ;;  %v1476_v31 = vmax.f32 %v1474_v10, %v2991_v46 }
 0x58c   :  { %v1468_v19 = vrot.slane %v1467_v45, 2 }
 0x58e   :  { %v1469_v7 = vmax.f32 %v1467_v45, %v1468_v19 }
 0x58f   :  { %v1456_v37 = vpop.f32.mrf.mxu3 }
 0x590   :  { %v1470_v14 = vrot.slane %v1469_v7, 1  ;;  %v2986_v5 = vadd.f32 %v1456_v37, %v1351_v23 }
 0x592   :  { %v1471_v47 = vmax.f32 %v1469_v7, %v1470_v14  ;;  %v1477_v55 = vmax.f32 %v1475_v13, %v2986_v5 }
 0x594   :  { %vm1485_vm0 = vcmp.eq.f32.partialorder %v1395_v29, %v1471_v47  ;;  %vm1487_vm2 = vcmp.eq.f32.partialorder %v1398_v16, %v1471_v47  ;;  %vm1489_vm4 = vcmp.eq.f32.partialorder %v1401_v6, %v1471_v47  ;;  %vm1491_vm5 = vcmp.eq.f32.partialorder %v1404_v11, %v1471_v47 }
 0x595   :  { %vm1493_vm6 = vcmp.eq.f32.partialorder %v1407_v63, %v1471_v47  ;;  %vm1495_vm7 = vcmp.eq.f32.partialorder %v1410_v27, %v1471_v47  ;;  %v1501_v51 = vsel %vm1485_vm0, %v2347_v54, 64  ;;  %v1503_v17 = vsel %vm1487_vm2, %v2350_v59, 64 }
 0x596   :  { %v1505_v0 = vsel %vm1489_vm4, %v2353_v60, 64  ;;  %v1507_v36 = vsel %vm1491_vm5, %v2356_v61, 64  ;;  %vm1497_vm8 = vcmp.eq.f32.partialorder %v1413_v26, %v1471_v47  ;;  %vm1499_vm10 = vcmp.eq.f32.partialorder %v1416_v24, %v1471_v47 }
 0x597   :  { %vm1517_vm12 = vcmp.lt.s32.totalorder %v1501_v51, %v1505_v0  ;;  %vm1519_vm13 = vcmp.lt.s32.totalorder %v1503_v17, %v1507_v36  ;;  %v1478_v29 = vmax.f32 %v1476_v31, %v1477_v55  ;;  %v1509_v6 = vsel %vm1493_vm6, %v2359_v62, 64 }
 0x598   :  { %v1511_v11 = vsel %vm1495_vm7, %v2362_v2, 64  ;;  %v1518_v16 = vsel %vm1517_vm12, %v1501_v51, %v1505_v0  ;;  %v1520_v63 = vsel %vm1519_vm13, %v1503_v17, %v1507_v36  ;;  %v1513_v30 = vsel %vm1497_vm8, %v2365_v3, 64  ;;  %v1976_v17 = vld [vmem:[%s3095_s3 + $0x60] sm:$0xff] }
 0x599   :  { %vm1521_vm14 = vcmp.lt.s32.totalorder %v1518_v16, %v1509_v6  ;;  %vm1523_vm9 = vcmp.lt.s32.totalorder %v1520_v63, %v1511_v11  ;;  %v1479_v27 = vrot.slane %v1478_v29, 4  ;;  %v1515_v58 = vsel %vm1499_vm10, %v2368_v4, 64 }
 0x59a   :  { %v1522_v38 = vsel %vm1521_vm14, %v1518_v16, %v1509_v6  ;;  %v1524_v44 = vsel %vm1523_vm9, %v1520_v63, %v1511_v11  ;;  %v1977_v6 = vld [vmem:[%s3095_s3 + $0x68] sm:$0xff] }
 0x59b   :  { %vm1525_vm11 = vcmp.lt.s32.totalorder %v1522_v38, %v1513_v30  ;;  %vm1527_vm15 = vcmp.lt.s32.totalorder %v1524_v44, %v1515_v58  ;;  %v1480_v26 = vmax.f32 %v1478_v29, %v1479_v27  ;;  %v3127_v27 = vld [vmem:[#allocation8_spill] sm:$0xff] }
 0x59c   :  { %v1526_v23 = vsel %vm1525_vm11, %v1522_v38, %v1513_v30  ;;  %v1528_v28 = vsel %vm1527_vm15, %v1524_v44, %v1515_v58  ;;  %v3128_v30 = vld [vmem:[#allocation10_spill] sm:$0xff] }
 0x59d   :  { %vm1529_vm1 = vcmp.lt.s32.totalorder %v1526_v23, %v1528_v28  ;;  %v1481_v39 = vrot.slane %v1480_v26, 2  ;;  %v849_v58 = vadd.f32 %v3128_v30, %v3127_v27 }
 0x59e   :  { %v1530_v43 = vsel %vm1529_vm1, %v1526_v23, %v1528_v28  ;;  %v3129_v28 = vld [vmem:[#allocation9_spill] sm:$0xff] }
 0x59f   :  { %v1531_v24 = vrot.slane %v1530_v43, 4  ;;  %v1482_v52 = vmax.f32 %v1480_v26, %v1481_v39  ;;  %v1272_v38 = vadd.f32 %v2914_v42, %v849_v58  ;;  %v3130_v39 = vld [vmem:[#allocation13_spill] sm:$0xff] }
 0x5a1   :  { %vm1532_vm0 = vcmp.lt.s32.totalorder %v1530_v43, %v1531_v24  ;;  %v1483_v35 = vrot.slane %v1482_v52, 1 }
 0x5a2   :  { %v1533_v57 = vsel %vm1532_vm0, %v1530_v43, %v1531_v24 }
 0x5a3   :  { %v1534_v48 = vrot.slane %v1533_v57, 2  ;;  %v1484_v15 = vmax.f32 %v1482_v52, %v1483_v35 }
 0x5a5   :  { %vm1535_vm2 = vcmp.lt.s32.totalorder %v1533_v57, %v1534_v48  ;;  %vm1486_vm4 = vcmp.eq.f32.partialorder %v2980_v34, %v1484_v15  ;;  %vm1488_vm5 = vcmp.eq.f32.partialorder %v2974_v21, %v1484_v15  ;;  %vm1490_vm6 = vcmp.eq.f32.partialorder %v2976_v12, %v1484_v15 }
 0x5a6   :  { %v1536_v45 = vsel %vm1535_vm2, %v1533_v57, %v1534_v48  ;;  %vm1492_vm7 = vcmp.eq.f32.partialorder %v2972_v8, %v1484_v15  ;;  %vm1494_vm8 = vcmp.eq.f32.partialorder %v2984_v1, %v1484_v15  ;;  %v1502_v7 = vsel %vm1486_vm4, %v2347_v54, 64 }
 0x5a7   :  { %v1537_v19 = vrot.slane %v1536_v45, 1  ;;  %vm1496_vm10 = vcmp.eq.f32.partialorder %v2978_v18, %v1484_v15  ;;  %v1504_v49 = vsel %vm1488_vm5, %v2350_v59, 64  ;;  %v1506_v37 = vsel %vm1490_vm6, %v2353_v60, 64 }
 0x5a8   :  { %v1508_v34 = vsel %vm1492_vm7, %v2356_v61, 64  ;;  %vm1498_vm13 = vcmp.eq.f32.partialorder %v2991_v46, %v1484_v15  ;;  %vm1500_vm14 = vcmp.eq.f32.partialorder %v2986_v5, %v1484_v15  ;;  %v1510_v8 = vsel %vm1494_vm8, %v2359_v62, 64 }
 0x5a9   :  { %vm1538_vm12 = vcmp.lt.s32.totalorder %v1536_v45, %v1537_v19  ;;  %vm1540_vm9 = vcmp.lt.s32.totalorder %v1502_v7, %v1506_v37  ;;  %vm1542_vm11 = vcmp.lt.s32.totalorder %v1504_v49, %v1508_v34  ;;  %v1512_v12 = vsel %vm1496_vm10, %v2362_v2, 64 }
 0x5aa   :  { %v1539_v21 = vsel %vm1538_vm12, %v1536_v45, %v1537_v19  ;;  %v1541_v1 = vsel %vm1540_vm9, %v1502_v7, %v1506_v37  ;;  %v1543_v18 = vsel %vm1542_vm11, %v1504_v49, %v1508_v34  ;;  %v1514_v14 = vsel %vm1498_vm13, %v2365_v3, 64 }
 0x5ab   :  { %vm1577_vm15 = vcmp.eq.s32.totalorder %v2368_v4, %v1539_v21  ;;  %vm1544_vm1 = vcmp.lt.s32.totalorder %v1541_v1, %v1510_v8  ;;  %vm1546_vm0 = vcmp.lt.s32.totalorder %v1543_v18, %v1512_v12  ;;  %v1516_v20 = vsel %vm1500_vm14, %v2368_v4, 64 }
 0x5ac   :  { %2012 = vmatpush.msk.msrb.mxu0 %vm1577_vm15, %v3120_v50  ;;  %v1545_v5 = vsel %vm1544_vm1, %v1541_v1, %v1510_v8  ;;  %v1547_v13 = vsel %vm1546_vm0, %v1543_v18, %v1512_v12  ;;  %vm1575_vm2 = vcmp.eq.s32.totalorder %v2365_v3, %v1539_v21  ;;  %vm1573_vm6 = vcmp.eq.s32.totalorder %v2362_v2, %v1539_v21 }
 0x5ad   :  { %vm1548_vm4 = vcmp.lt.s32.totalorder %v1545_v5, %v1514_v14  ;;  %vm1550_vm5 = vcmp.lt.s32.totalorder %v1547_v13, %v1516_v20  ;;  %vm1571_vm8 = vcmp.eq.s32.totalorder %v2359_v62, %v1539_v21  ;;  %vm1569_vm10 = vcmp.eq.s32.totalorder %v2356_v61, %v1539_v21 }
 0x5ae   :  { %2013 = vmatpush.msk.msrb.mxu0 %vm1575_vm2, %v3120_v50  ;;  %v1549_v46 = vsel %vm1548_vm4, %v1545_v5, %v1514_v14  ;;  %v1551_v47 = vsel %vm1550_vm5, %v1547_v13, %v1516_v20  ;;  %vm1567_vm13 = vcmp.eq.s32.totalorder %v2353_v60, %v1539_v21  ;;  %vm1565_vm14 = vcmp.eq.s32.totalorder %v2350_v59, %v1539_v21 }
 0x5af   :  { %vm1552_vm7 = vcmp.lt.s32.totalorder %v1549_v46, %v1551_v47  ;;  %vm1563_vm11 = vcmp.eq.s32.totalorder %v2347_v54, %v1539_v21  ;;  %vm1711_vm1 = vcmask 1042432   ;;  %vm1715_vm4 = vcmask 1043456  }
 0x5b0   :  { %2014 = vmatpush.msk.msrb.mxu0 %vm1573_vm6, %v3120_v50  ;;  %v1553_v10 = vsel %vm1552_vm7, %v1549_v46, %v1551_v47  ;;  %v1712_v63 = vsel %vm1711_vm1, %v2838_v53, %v1539_v21 }
 0x5b1   :  { %v1554_v55 = vrot.slane %v1553_v10, 4 }
 0x5b2   :  { %2015 = vmatpush.msk.msrb.mxu0 %vm1571_vm8, %v3120_v50 }
 0x5b3   :  { %vm1555_vm12 = vcmp.lt.s32.totalorder %v1553_v10, %v1554_v55 }
 0x5b4   :  { %2016 = vmatpush.msk.msrb.mxu0 %vm1569_vm10, %v3120_v50  ;;  %v1556_v31 = vsel %vm1555_vm12, %v1553_v10, %v1554_v55 }
 0x5b5   :  { %v1557_v51 = vrot.slane %v1556_v31, 2 }
 0x5b6   :  { %2017 = vmatpush.msk.msrb.mxu0 %vm1567_vm13, %v3120_v50 }
 0x5b7   :  { %vm1558_vm9 = vcmp.lt.s32.totalorder %v1556_v31, %v1557_v51 }
 0x5b8   :  { %2018 = vmatpush.msk.msrb.mxu0 %vm1565_vm14, %v3120_v50  ;;  %v1559_v0 = vsel %vm1558_vm9, %v1556_v31, %v1557_v51 }
 0x5b9   :  { %v1560_v36 = vrot.slane %v1559_v0, 1 }
 0x5ba   :  { %2019 = vmatpush.msk.msrb.mxu0 %vm1563_vm11, %v3120_v50 }
 0x5bb   :  { %2020 = vmatmul.msk.f32.vlgmr.msrb.gmra.mxu0 %vm357_vm3, %v1976_v17  ;;  %vm1561_vm15 = vcmp.lt.s32.totalorder %v1559_v0, %v1560_v36 }
 0x5bc   :  { %v1562_v29 = vsel %vm1561_vm15, %v1559_v0, %v1560_v36 }
 0x5bd   :  { %vm1578_vm0 = vcmp.eq.s32.totalorder %v2368_v4, %v1562_v29  ;;  %vm1576_vm2 = vcmp.eq.s32.totalorder %v2365_v3, %v1562_v29  ;;  %v1713_v11 = vsel %vm1711_vm1, %v2863_v41, %v1562_v29  ;;  %vm1574_vm5 = vcmp.eq.s32.totalorder %v2362_v2, %v1562_v29  ;;  %v1978_v2 = vld [vmem:[%s3095_s3 + $0x70] sm:$0xff] }
 0x5be   :  { %2024 = vmatpush.msk.msrb.mxu1 %vm1578_vm0, %v3120_v50  ;;  %v1714_v16 = vrot.slane %v1713_v11, 4  ;;  %vm1572_vm6 = vcmp.eq.s32.totalorder %v2359_v62, %v1562_v29  ;;  %vm1570_vm7 = vcmp.eq.s32.totalorder %v2356_v61, %v1562_v29  ;;  %vm1568_vm8 = vcmp.eq.s32.totalorder %v2353_v60, %v1562_v29  ;;  %v1979_v60 = vld [vmem:[%s3095_s3 + $0x78] sm:$0xff]  ;;  %s2100_s3 = smov [#allocation2]  }
 0x5bf   :  { %vm1566_vm10 = vcmp.eq.s32.totalorder %v2350_v59, %v1562_v29  ;;  %vm1564_vm12 = vcmp.eq.s32.totalorder %v2347_v54, %v1562_v29  ;;  %s1722_s5 = sshll.u32 %s2100_s3, 4  ;;  %s1723_s5 = int_to_ptr.vmem [resolvable:$true] %s1722_s5 }
 0x5c0   :  { %2025 = vmatpush.msk.msrb.mxu1 %vm1576_vm2, %v3120_v50  ;;  %v1716_v4 = vsel %vm1715_vm4, %v1712_v63, %v1714_v16 }
 0x5c1   :  { %1717 = vst [vmem:[#allocation4] sm:$0xff] %v1716_v4 }
 0x5c2   :  { %2026 = vmatpush.msk.msrb.mxu1 %vm1574_vm5, %v3120_v50  ;;  %1741 = dma.vmem_to_hbm [thread:$0]  %s1737_s12, 128, %s1739_s2, [#allocation5]  }
 0x5c3   :  { %2021 = vmatmul.msk.f32.gmra.mxu0 %vm357_vm3, %v1977_v6 }
 0x5c4   :  { %2027 = vmatpush.msk.msrb.mxu1 %vm1572_vm6, %v3120_v50 }
 0x5c6   :  { %2028 = vmatpush.msk.msrb.mxu1 %vm1570_vm7, %v3120_v50 }
 0x5c8   :  { %2029 = vmatpush.msk.msrb.mxu1 %vm1568_vm8, %v3120_v50 }
 0x5ca   :  { %2030 = vmatpush.msk.msrb.mxu1 %vm1566_vm10, %v3120_v50 }
 0x5cb   :  { %2022 = vmatmul.msk.f32.gmra.mxu0 %vm357_vm3, %v1978_v2 }
 0x5cc   :  { %2031 = vmatpush.msk.msrb.mxu1 %vm1564_vm12, %v3120_v50 }
 0x5cd   :  { %2032 = vmatmul.msk.f32.vlgmr.msrb.gmra.mxu1 %vm357_vm3, %v1976_v17 }
 0x5d3   :  { %2023 = vmatmul.msk.f32.gmra.mxu0 %vm357_vm3, %v1979_v60 }
 0x5d5   :  { %2033 = vmatmul.msk.f32.gmra.mxu1 %vm357_vm3, %v1977_v6 }
 0x5dd   :  { %2034 = vmatmul.msk.f32.gmra.mxu1 %vm357_vm3, %v1978_v2 }
 0x5e5   :  { %2035 = vmatmul.msk.f32.gmra.mxu1 %vm357_vm3, %v1979_v60 }
 0x638   :  { %v1640_v54 = vpop.f32.mrf.mxu0 }
 0x639   :  { %v1689_v59 = vadd.f32 %v1640_v54, %v2896_v40 }
 0x63b   :  { %1697 = vst [vmem:[#allocation2] sm:$0xff] %v1689_v59 }
 0x640   :  { %v1643_v61 = vpop.f32.mrf.mxu0 }
 0x641   :  { %v1691_v62 = vadd.f32 %v1643_v61, %v2900_v22 }
 0x643   :  { %1699 = vst [vmem:[#allocation2 + $0x10] sm:$0xff] %v1691_v62 }
 0x648   :  { %v1646_v3 = vpop.f32.mrf.mxu0 }
 0x649   :  { %v1693_v50 = vadd.f32 %v1646_v3, %v2908_v9 }
 0x64a   :  { %v1669_v53 = vpop.f32.mrf.mxu1 }
 0x64b   :  { %1701 = vst [vmem:[#allocation2 + $0x20] sm:$0xff] %v1693_v50  ;;  %v1690_v41 = vadd.f32 %v1669_v53, %v2906_v56  ;;  %v850_v56 = vadd.f32 %v3130_v39, %v3129_v28 }
 0x64d   :  { %1698 = vst [vmem:[#allocation2 + $0x8] sm:$0xff] %v1690_v41  ;;  %v1273_v42 = vadd.f32 %v2929_v32, %v850_v56 }
 0x650   :  { %v1649_v44 = vpop.f32.mrf.mxu0 }
 0x651   :  { %v1695_v40 = vadd.f32 %v1649_v44, %v1272_v38 }
 0x652   :  { %v1672_v26 = vpop.f32.mrf.mxu1 }
 0x653   :  { %1703 = vst [vmem:[#allocation2 + $0x30] sm:$0xff] %v1695_v40  ;;  %v1692_v22 = vadd.f32 %v1672_v26, %v2912_v25 }
 0x655   :  { %1700 = vst [vmem:[#allocation2 + $0x18] sm:$0xff] %v1692_v22 }
 0x65a   :  { %v1675_v23 = vpop.f32.mrf.mxu1 }
 0x65b   :  { %v1694_v9 = vadd.f32 %v1675_v23, %v2923_v33 }
 0x65d   :  { %1702 = vst [vmem:[#allocation2 + $0x28] sm:$0xff] %v1694_v9 }
 0x662   :  { %v1678_v43 = vpop.f32.mrf.mxu1 }
 0x663   :  { %v1696_v25 = vadd.f32 %v1678_v43, %v1273_v42 }
 0x665   :  { %1704 = vst [vmem:[#allocation2 + $0x38] sm:$0xff] %v1696_v25 }
 0x666   :  { %1730 = dma.vmem_to_hbm [thread:$0]  %s1723_s5, 1024, %s1725_s15, [#allocation3], %s2101_s16, %s2101_s16, %s2102_s17  }
 0x667   :  { %2093 = dma.done.wait [#allocation3], 1024  }
 0x668   :  { %2094 = vsyncadd [#allocation3], 4294966272 }
 0x669   :  { %2095 = dma.done.wait [#allocation5], 128  }
 0x66a   :  { %2096 = vsyncadd [#allocation5], 4294967168 }
 0x66b   :  { %1750 = vsyncpa [#allocation3], 1 }
 0x66c   :  { %1751 = vsyncpa [#allocation5], 1 }

</bundles_post_ra>
